<compile_context>
chip_gen: v7x
topology: tpu7x:2x2x1
jax: 0.10.0
libtpu: 0.0.40
codegen_flags: <defaults>
</compile_context>

<pallas_src>
import functools

import jax
import jax.numpy as jnp
from jax.experimental import pallas as pl
from jax.experimental.pallas import tpu as pltpu

BN_EPS = 1e-5


# ----------------------------------------------------------------------------
# Pallas kernels (all math fused per layer)
# ----------------------------------------------------------------------------
def _conv_bn_relu_kernel(p_ref, w_ref, b_ref, g_ref, bb_ref, o_ref):
    """o = relu(batchnorm(patches @ w + b)); stats over the M rows (= N*H*W)."""
    y = jnp.dot(p_ref[...], w_ref[...], preferred_element_type=jnp.float32)
    y = y + b_ref[...]
    m = y.shape[0]
    mean = jnp.sum(y, axis=0, keepdims=True) * (1.0 / m)
    d = y - mean
    var = jnp.sum(d * d, axis=0, keepdims=True) * (1.0 / m)     # biased (train mode)
    scale = g_ref[...] * jax.lax.rsqrt(var + BN_EPS)
    o_ref[...] = jnp.maximum(d * scale + bb_ref[...], 0.0).astype(o_ref.dtype)


def _deconv_bn_relu_kernel(p_ref, w_ref, b_ref, g_ref, bb_ref, a_ref, o_ref):
    """Sub-pixel ConvTranspose + BN + ReLU.

    y columns are ordered (parity_y, parity_x, cout); the 0/1 pooling matrix A
    (A[i,j] = 1 iff i%Cout == j%Cout) pools BN statistics across the 4 parity
    groups so they equal the stats of the interleaved full-resolution output.
    gamma/beta arrive pre-tiled to (1, 4*Cout).
    """
    y = jnp.dot(p_ref[...], w_ref[...], preferred_element_type=jnp.float32)
    y = y + b_ref[...]
    a = a_ref[...]
    m = y.shape[0]
    inv_cnt = 1.0 / (4.0 * m)
    mean = jnp.sum(jnp.dot(y, a, preferred_element_type=jnp.float32),
                   axis=0, keepdims=True) * inv_cnt             # (1, 4*Cout)
    d = y - mean
    var = jnp.sum(jnp.dot(d * d, a, preferred_element_type=jnp.float32),
                  axis=0, keepdims=True) * inv_cnt
    scale = g_ref[...] * jax.lax.rsqrt(var + BN_EPS)
    o_ref[...] = jnp.maximum(d * scale + bb_ref[...], 0.0).astype(o_ref.dtype)


def _deconv_sigmoid_kernel(p_ref, w_ref, b_ref, o_ref):
    y = jnp.dot(p_ref[...], w_ref[...], preferred_element_type=jnp.float32)
    o_ref[...] = jax.nn.sigmoid(y + b_ref[...]).astype(o_ref.dtype)


def _mlp_kernel(x_ref, w1_ref, b1_ref, w2_ref, b2_ref, w3_ref, b3_ref,
                w4_ref, b4_ref, enc_ref, dec_ref):
    """Fused bottleneck: fc1+ReLU+fc2 (encoder) and fc3+ReLU+fc4+ReLU (decoder)."""
    x = x_ref[...]
    h = jnp.dot(x, w1_ref[...], preferred_element_type=jnp.float32) + b1_ref[...]
    h = jnp.maximum(h, 0.0).astype(jnp.bfloat16)
    enc = jnp.dot(h, w2_ref[...], preferred_element_type=jnp.float32) + b2_ref[...]
    enc_ref[...] = enc.astype(enc_ref.dtype)
    h2 = jnp.dot(enc.astype(jnp.bfloat16), w3_ref[...],
                 preferred_element_type=jnp.float32) + b3_ref[...]
    h2 = jnp.maximum(h2, 0.0).astype(jnp.bfloat16)
    d = jnp.dot(h2, w4_ref[...], preferred_element_type=jnp.float32) + b4_ref[...]
    dec_ref[...] = jnp.maximum(d, 0.0).astype(dec_ref.dtype)


# ----------------------------------------------------------------------------
# pallas_call wrappers
# ----------------------------------------------------------------------------
def _full(shape):
    return pl.BlockSpec(shape, lambda i, _n=len(shape): (0,) * _n)


_ARB = pltpu.CompilerParams(dimension_semantics=("arbitrary",))


def conv_bn_relu(patches, w, b, gamma, beta):
    M, K = patches.shape
    Cout = w.shape[1]
    return pl.pallas_call(
        _conv_bn_relu_kernel,
        out_shape=jax.ShapeDtypeStruct((M, Cout), jnp.bfloat16),
        grid=(1,),
        in_specs=[_full((M, K)), _full((K, Cout)),
                  _full((1, Cout)), _full((1, Cout)), _full((1, Cout))],
        out_specs=_full((M, Cout)),
        compiler_params=_ARB,
    )(patches, w, b, gamma, beta)


def deconv_bn_relu(patches, w, b, gamma, beta, pool):
    M, K = patches.shape
    C4 = w.shape[1]
    return pl.pallas_call(
        _deconv_bn_relu_kernel,
        out_shape=jax.ShapeDtypeStruct((M, C4), jnp.bfloat16),
        grid=(1,),
        in_specs=[_full((M, K)), _full((K, C4)),
                  _full((1, C4)), _full((1, C4)), _full((1, C4)),
                  _full((C4, C4))],
        out_specs=_full((M, C4)),
        compiler_params=_ARB,
    )(patches, w, b, gamma, beta, pool)


def deconv_sigmoid(patches, w, b):
    M, K = patches.shape
    C4 = w.shape[1]
    tm = min(M, 256)
    if M % tm != 0 or tm % 8 != 0:
        tm = M                           # fall back to a single full block
    return pl.pallas_call(
        _deconv_sigmoid_kernel,
        out_shape=jax.ShapeDtypeStruct((M, C4), jnp.float32),
        grid=(M // tm,),
        in_specs=[pl.BlockSpec((tm, K), lambda i: (i, 0)),
                  pl.BlockSpec((K, C4), lambda i: (0, 0)),
                  pl.BlockSpec((1, C4), lambda i: (0, 0))],
        out_specs=pl.BlockSpec((tm, C4), lambda i: (i, 0)),
        compiler_params=pltpu.CompilerParams(dimension_semantics=("parallel",)),
    )(patches, w, b)


def mlp_fused(x, p):
    N, feat = x.shape
    hidden = p["wf1"].shape[1]
    bneck = p["wf2"].shape[1]
    return pl.pallas_call(
        _mlp_kernel,
        out_shape=(jax.ShapeDtypeStruct((N, bneck), jnp.float32),
                   jax.ShapeDtypeStruct((N, feat), jnp.bfloat16)),
        grid=(1,),
        in_specs=[_full(x.shape),
                  _full(p["wf1"].shape), _full(p["bf1"].shape),
                  _full(p["wf2"].shape), _full(p["bf2"].shape),
                  _full(p["wf3"].shape), _full(p["bf3"].shape),
                  _full(p["wf4"].shape), _full(p["bf4"].shape)],
        out_specs=(_full((N, bneck)), _full((N, feat))),
        compiler_params=_ARB,
    )(x, p["wf1"], p["bf1"], p["wf2"], p["bf2"],
      p["wf3"], p["bf3"], p["wf4"], p["bf4"])


# ----------------------------------------------------------------------------
# Cheap XLA-side layout helpers (pure data movement, KB-scale here)
# ----------------------------------------------------------------------------
def _im2col_s2(x_nhwc, k=3, stride=2, pad=1):
    """NHWC strided im2col; feature order (ky, kx, cin) matching weight prep."""
    N, H, W, C = x_nhwc.shape
    Ho = (H + 2 * pad - k) // stride + 1
    Wo = (W + 2 * pad - k) // stride + 1
    xp = jnp.pad(x_nhwc, ((0, 0), (pad, pad), (pad, pad), (0, 0)))
    cols = [xp[:, ky:ky + stride * Ho:stride, kx:kx + stride * Wo:stride, :]
            for ky in range(k) for kx in range(k)]
    patches = jnp.concatenate(cols, axis=-1)           # (N, Ho, Wo, k*k*C)
    return patches.reshape(N * Ho * Wo, k * k * C), Ho, Wo


def _subpixel_patches(x_nhwc):
    """2x2 taps (dy, dx) with zero pad on bottom/right -> (N*H*W, 4*C)."""
    N, H, W, C = x_nhwc.shape
    xp = jnp.pad(x_nhwc, ((0, 0), (0, 1), (0, 1), (0, 0)))
    cols = [xp[:, dy:dy + H, dx:dx + W, :] for dy in (0, 1) for dx in (0, 1)]
    return jnp.concatenate(cols, axis=-1).reshape(N * H * W, 4 * C)


def _pixel_shuffle2(y, N, H, W, Cout):
    """(N*H*W, 4*Cout) with col order (py, px, c) -> (N, 2H, 2W, Cout)."""
    y = y.reshape(N, H, W, 2, 2, Cout).transpose(0, 1, 3, 2, 4, 5)
    return y.reshape(N, 2 * H, 2 * W, Cout)


# ----------------------------------------------------------------------------
# Parameter preparation (done once, outside the jitted forward)
# ----------------------------------------------------------------------------
def prepare_params(raw, initial_channels, hidden_dim, bottleneck_dim, img_size):
    C = initial_channels
    f = img_size // 4
    feat = 2 * C * f * f
    bf, f32 = jnp.bfloat16, jnp.float32

    def conv_w(w):  # (Cout, Cin, k, k) -> (k*k*Cin, Cout), (ky,kx,cin) rows
        Cout, Cin, k, _ = w.shape
        return w.transpose(2, 3, 1, 0).reshape(k * k * Cin, Cout).astype(bf)

    def deconv_w(w):  # (Cin, Cout, 3, 3) -> sub-pixel (4*Cin, 4*Cout)
        Cin, Cout = w.shape[0], w.shape[1]
        rows = []
        for dy in (0, 1):
            for dx in (0, 1):
                cols = []
                for py in (0, 1):
                    for px in (0, 1):
                        ky = py + 1 - 2 * dy
                        kx = px + 1 - 2 * dx
                        if 0 <= ky <= 2 and 0 <= kx <= 2:
                            cols.append(w[:, :, ky, kx])
                        else:
                            cols.append(jnp.zeros((Cin, Cout), w.dtype))
                rows.append(jnp.concatenate(cols, axis=1))
        return jnp.concatenate(rows, axis=0).astype(bf)

    def row(v):
        return v.reshape(1, -1).astype(f32)

    def pool_mat(cout):  # (4C,4C): A[i,j] = 1 iff i%C == j%C (parity pooling)
        idx = jnp.arange(4 * cout)
        return (idx[:, None] % cout == idx[None, :] % cout).astype(f32)

    p = {
        "w1": conv_w(raw["c1_w"]), "b1": row(raw["c1_b"]),
        "g1": row(raw["bn1_g"]), "be1": row(raw["bn1_b"]),
        "w2": conv_w(raw["c2_w"]), "b2": row(raw["c2_b"]),
        "g2": row(raw["bn2_g"]), "be2": row(raw["bn2_b"]),
    }

    # FC weights: pre-transpose to (in, out) and permute the image-feature axis
    # from PyTorch's (c, h, w) Flatten order to our NHWC (h, w, c) order.
    fc1 = raw["fc1_w"].reshape(hidden_dim, 2 * C, f, f).transpose(0, 2, 3, 1)
    p["wf1"] = fc1.reshape(hidden_dim, feat).T.astype(bf)
    p["bf1"] = row(raw["fc1_b"])
    p["wf2"] = raw["fc2_w"].T.astype(bf)
    p["bf2"] = row(raw["fc2_b"])
    p["wf3"] = raw["fc3_w"].T.astype(bf)
    p["bf3"] = row(raw["fc3_b"])
    fc4 = raw["fc4_w"].reshape(2 * C, f, f, hidden_dim).transpose(1, 2, 0, 3)
    p["wf4"] = fc4.reshape(feat, hidden_dim).T.astype(bf)
    p["bf4"] = row(raw["fc4_b"].reshape(2 * C, f, f).transpose(1, 2, 0).reshape(feat))

    p["wt1"] = deconv_w(raw["ct1_w"])                  # (4*2C, 4*C)
    p["bt1"] = row(jnp.tile(raw["ct1_b"], 4))
    p["g3"] = row(jnp.tile(raw["bn3_g"], 4))
    p["be3"] = row(jnp.tile(raw["bn3_b"], 4))
    p["A3"] = pool_mat(C)
    p["wt2"] = deconv_w(raw["ct2_w"])                  # (4*C, 4)
    p["bt2"] = row(jnp.tile(raw["ct2_b"], 4))
    return p


# ----------------------------------------------------------------------------
# CAE forward (5 pallas_calls)
# ----------------------------------------------------------------------------
def cae_forward(x_nchw, p, initial_channels, img_size):
    C = initial_channels
    f = img_size // 4
    N = x_nchw.shape[0]

    x = x_nchw.transpose(0, 2, 3, 1).astype(jnp.bfloat16)          # NHWC, once

    # ------------------------------ encoder ------------------------------
    pt1, Ho, Wo = _im2col_s2(x)                                    # (N*Ho*Wo, 9)
    y1 = conv_bn_relu(pt1, p["w1"], p["b1"], p["g1"], p["be1"])    # (N*Ho*Wo, C)
    y1 = y1.reshape(N, Ho, Wo, C)

    pt2, Ho2, Wo2 = _im2col_s2(y1)                                 # (N*f*f, 9C)
    y2 = conv_bn_relu(pt2, p["w2"], p["b2"], p["g2"], p["be2"])    # (N*f*f, 2C)

    # Flatten is a free row-major reshape: rows are (n, h, w), channels last,
    # which matches the (h, w, c)-permuted FC weights.
    flat = y2.reshape(N, f * f * 2 * C)
    encoded, dflat = mlp_fused(flat, p)            # (N, bneck) f32, (N, feat) bf16

    # ------------------------------ decoder ------------------------------
    d = dflat.reshape(N, f, f, 2 * C)
    dp1 = _subpixel_patches(d)                                     # (N*f*f, 8C)
    t1 = deconv_bn_relu(dp1, p["wt1"], p["bt1"], p["g3"], p["be3"], p["A3"])
    t1 = _pixel_shuffle2(t1, N, f, f, C)                           # (N, 2f, 2f, C)

    dp2 = _subpixel_patches(t1)                                    # (N*4f^2, 4C)
    t2 = deconv_sigmoid(dp2, p["wt2"], p["bt2"])                   # (N*4f^2, 4)
    dec = _pixel_shuffle2(t2, N, 2 * f, 2 * f, 1)                  # (N, 4f, 4f, 1)
    decoded = dec.transpose(0, 3, 1, 2)                            # NCHW, once
    return encoded, decoded


# ----------------------------------------------------------------------------
# PyTorch-layout parameter init (raw), then prepared once
# ----------------------------------------------------------------------------
def init_params(key, initial_channels, hidden_dim, bottleneck_dim, img_size):
    C = initial_channels
    f = img_size // 4
    feat = 2 * C * f * f
    keys = jax.random.split(key, 10)
    scale = 0.1

    def rnd(k, shape):
        return (scale * jax.random.normal(k, shape)).astype(jnp.float32)

    return {
        "c1_w": rnd(keys[0], (C, 1, 3, 3)), "c1_b": rnd(keys[1], (C,)),
        "bn1_g": jnp.ones((C,), jnp.float32), "bn1_b": jnp.zeros((C,), jnp.float32),
        "c2_w": rnd(keys[2], (2 * C, C, 3, 3)), "c2_b": rnd(keys[3], (2 * C,)),
        "bn2_g": jnp.ones((2 * C,), jnp.float32), "bn2_b": jnp.zeros((2 * C,), jnp.float32),
        "fc1_w": rnd(keys[4], (hidden_dim, feat)), "fc1_b": jnp.zeros((hidden_dim,), jnp.float32),
        "fc2_w": rnd(keys[5], (bottleneck_dim, hidden_dim)), "fc2_b": jnp.zeros((bottleneck_dim,), jnp.float32),
        "fc3_w": rnd(keys[6], (hidden_dim, bottleneck_dim)), "fc3_b": jnp.zeros((hidden_dim,), jnp.float32),
        "fc4_w": rnd(keys[7], (feat, hidden_dim)), "fc4_b": jnp.zeros((feat,), jnp.float32),
        "ct1_w": rnd(keys[8], (2 * C, C, 3, 3)), "ct1_b": jnp.zeros((C,), jnp.float32),
        "bn3_g": jnp.ones((C,), jnp.float32), "bn3_b": jnp.zeros((C,), jnp.float32),
        "ct2_w": rnd(keys[9], (C, 1, 3, 3)), "ct2_b": jnp.zeros((1,), jnp.float32),
    }


if __name__ == "__main__":
    # config consistent with the module: CAE(initial_channels=4, hidden_dim=32,
    # bottleneck_dim=16, img_size=16), batch=2
    INITIAL_CHANNELS = 4
    HIDDEN_DIM = 32
    BOTTLENECK_DIM = 16
    IMG_SIZE = 16
    BATCH = 2

    key = jax.random.PRNGKey(0)
    k_x, k_p = jax.random.split(key)
    x = jax.random.normal(k_x, (BATCH, 1, IMG_SIZE, IMG_SIZE), dtype=jnp.float32)
    raw = init_params(k_p, INITIAL_CHANNELS, HIDDEN_DIM, BOTTLENECK_DIM, IMG_SIZE)
    params = prepare_params(raw, INITIAL_CHANNELS, HIDDEN_DIM, BOTTLENECK_DIM, IMG_SIZE)

    fwd = jax.jit(functools.partial(cae_forward,
                                    initial_channels=INITIAL_CHANNELS,
                                    img_size=IMG_SIZE))
    encoded, decoded = fwd(x, params)
    jax.block_until_ready((encoded, decoded))

    assert encoded.shape == (BATCH, BOTTLENECK_DIM), encoded.shape
    assert decoded.shape == (BATCH, 1, IMG_SIZE, IMG_SIZE), decoded.shape
    assert bool(jnp.all(jnp.isfinite(encoded))) and bool(jnp.all(jnp.isfinite(decoded)))
    assert bool(jnp.all(decoded >= 0.0)) and bool(jnp.all(decoded <= 1.0))  # sigmoid range
    print("KERNEL_OK")
</pallas_src>

<mosaic_0001>
module attributes {stable_mosaic.version = 11 : i64} {
  func.func @_conv_bn_relu_kernel(%arg0: i32, %arg1: memref<128x9xbf16, #tpu.memory_space<vmem>>, %arg2: memref<9x4xbf16, #tpu.memory_space<vmem>>, %arg3: memref<1x4xf32, #tpu.memory_space<vmem>>, %arg4: memref<1x4xf32, #tpu.memory_space<vmem>>, %arg5: memref<1x4xf32, #tpu.memory_space<vmem>>, %arg6: memref<128x4xbf16, #tpu.memory_space<vmem>>) attributes {dimension_semantics = [#tpu.dimension_semantics<arbitrary>], iteration_bounds = array<i64: 1>, scalar_prefetch = 0 : i64, scratch_operands = 0 : i64, tpu.core_type = #tpu.core_type<tc>, window_params = [{pipeline_mode = #tpu.pipeline_mode<synchronous>, transform_indices = @transform_0, window_bounds = array<i64: 128, 9>}, {pipeline_mode = #tpu.pipeline_mode<synchronous>, transform_indices = @transform_1, window_bounds = array<i64: 9, 4>}, {pipeline_mode = #tpu.pipeline_mode<synchronous>, transform_indices = @transform_2, window_bounds = array<i64: 1, 4>}, {pipeline_mode = #tpu.pipeline_mode<synchronous>, transform_indices = @transform_3, window_bounds = array<i64: 1, 4>}, {pipeline_mode = #tpu.pipeline_mode<synchronous>, transform_indices = @transform_4, window_bounds = array<i64: 1, 4>}, {pipeline_mode = #tpu.pipeline_mode<synchronous>, transform_indices = @transform_5, window_bounds = array<i64: 128, 4>}]} {
    %c0 = arith.constant 0 : index
    %c0_0 = arith.constant 0 : index
    %0 = vector.load %arg1[%c0, %c0_0] : memref<128x9xbf16, #tpu.memory_space<vmem>>, vector<128x9xbf16>
    %c0_1 = arith.constant 0 : index
    %c0_2 = arith.constant 0 : index
    %1 = vector.load %arg2[%c0_1, %c0_2] : memref<9x4xbf16, #tpu.memory_space<vmem>>, vector<9x4xbf16>
    %cst = arith.constant dense<0.000000e+00> : vector<128x4xf32>
    %2 = tpu.matmul %0, %1, %cst {dimension_numbers = #tpu.dot_dimension_numbers<[1], [0], [0], [1], [0, 0, 1, 1], [], []>} : vector<128x9xbf16>, vector<9x4xbf16>, vector<128x4xf32> -> vector<128x4xf32>
    %c0_3 = arith.constant 0 : index
    %c0_4 = arith.constant 0 : index
    %3 = vector.load %arg3[%c0_3, %c0_4] : memref<1x4xf32, #tpu.memory_space<vmem>>, vector<1x4xf32>
    %4 = vector.broadcast %3 : vector<1x4xf32> to vector<128x4xf32>
    %5 = arith.addf %2, %4 : vector<128x4xf32>
    %cst_5 = arith.constant dense<0.000000e+00> : vector<4xf32>
    %6 = vector.multi_reduction <add>, %5, %cst_5 [0] : vector<128x4xf32> to vector<4xf32>
    %7 = vector.shape_cast %6 : vector<4xf32> to vector<1x4xf32>
    %cst_6 = arith.constant 7.812500e-03 : f32
    %8 = vector.broadcast %cst_6 : f32 to vector<1x4xf32>
    %9 = arith.mulf %7, %8 : vector<1x4xf32>
    %10 = vector.broadcast %9 : vector<1x4xf32> to vector<128x4xf32>
    %11 = arith.subf %5, %10 : vector<128x4xf32>
    %12 = arith.mulf %11, %11 : vector<128x4xf32>
    %cst_7 = arith.constant dense<0.000000e+00> : vector<4xf32>
    %13 = vector.multi_reduction <add>, %12, %cst_7 [0] : vector<128x4xf32> to vector<4xf32>
    %14 = vector.shape_cast %13 : vector<4xf32> to vector<1x4xf32>
    %cst_8 = arith.constant 7.812500e-03 : f32
    %15 = vector.broadcast %cst_8 : f32 to vector<1x4xf32>
    %16 = arith.mulf %14, %15 : vector<1x4xf32>
    %c0_9 = arith.constant 0 : index
    %c0_10 = arith.constant 0 : index
    %17 = vector.load %arg4[%c0_9, %c0_10] : memref<1x4xf32, #tpu.memory_space<vmem>>, vector<1x4xf32>
    %cst_11 = arith.constant 9.99999974E-6 : f32
    %18 = vector.broadcast %cst_11 : f32 to vector<1x4xf32>
    %19 = arith.addf %16, %18 : vector<1x4xf32>
    %20 = math.rsqrt %19 : vector<1x4xf32>
    %21 = arith.mulf %17, %20 : vector<1x4xf32>
    %22 = vector.broadcast %21 : vector<1x4xf32> to vector<128x4xf32>
    %23 = arith.mulf %11, %22 : vector<128x4xf32>
    %c0_12 = arith.constant 0 : index
    %c0_13 = arith.constant 0 : index
    %24 = vector.load %arg5[%c0_12, %c0_13] : memref<1x4xf32, #tpu.memory_space<vmem>>, vector<1x4xf32>
    %25 = vector.broadcast %24 : vector<1x4xf32> to vector<128x4xf32>
    %26 = arith.addf %23, %25 : vector<128x4xf32>
    %cst_14 = arith.constant 0.000000e+00 : f32
    %27 = vector.broadcast %cst_14 : f32 to vector<128x4xf32>
    %28 = arith.maximumf %26, %27 : vector<128x4xf32>
    %29 = arith.truncf %28 : vector<128x4xf32> to vector<128x4xbf16>
    %c0_15 = arith.constant 0 : index
    %c0_16 = arith.constant 0 : index
    %30 = vector.load %arg6[%c0_15, %c0_16] : memref<128x4xbf16, #tpu.memory_space<vmem>>, vector<128x4xbf16>
    tpu.vector_store %arg6[%c0_15, %c0_16], %29 {strides = array<i32>} : memref<128x4xbf16, #tpu.memory_space<vmem>>, vector<128x4xbf16>,
    return
  }
  func.func @transform_0(%arg0: i32) -> (i32, i32) {
    %c0_i32 = arith.constant 0 : i32
    %c0_i32_0 = arith.constant 0 : i32
    %c0_i32_1 = arith.constant 0 : i32
    return %c0_i32, %c0_i32_0 : i32, i32
  }
  func.func @transform_1(%arg0: i32) -> (i32, i32) {
    %c0_i32 = arith.constant 0 : i32
    %c0_i32_0 = arith.constant 0 : i32
    %c0_i32_1 = arith.constant 0 : i32
    return %c0_i32, %c0_i32_0 : i32, i32
  }
  func.func @transform_2(%arg0: i32) -> (i32, i32) {
    %c0_i32 = arith.constant 0 : i32
    %c0_i32_0 = arith.constant 0 : i32
    %c0_i32_1 = arith.constant 0 : i32
    return %c0_i32, %c0_i32_0 : i32, i32
  }
  func.func @transform_3(%arg0: i32) -> (i32, i32) {
    %c0_i32 = arith.constant 0 : i32
    %c0_i32_0 = arith.constant 0 : i32
    %c0_i32_1 = arith.constant 0 : i32
    return %c0_i32, %c0_i32_0 : i32, i32
  }
  func.func @transform_4(%arg0: i32) -> (i32, i32) {
    %c0_i32 = arith.constant 0 : i32
    %c0_i32_0 = arith.constant 0 : i32
    %c0_i32_1 = arith.constant 0 : i32
    return %c0_i32, %c0_i32_0 : i32, i32
  }
  func.func @transform_5(%arg0: i32) -> (i32, i32) {
    %c0_i32 = arith.constant 0 : i32
    %c0_i32_0 = arith.constant 0 : i32
    %c0_i32_1 = arith.constant 0 : i32
    return %c0_i32, %c0_i32_0 : i32, i32
  }
}

module attributes {stable_mosaic.version = 11 : i64} {
  func.func @_conv_bn_relu_kernel(%arg0: i32, %arg1: memref<32x36xbf16, #tpu.memory_space<vmem>>, %arg2: memref<36x8xbf16, #tpu.memory_space<vmem>>, %arg3: memref<1x8xf32, #tpu.memory_space<vmem>>, %arg4: memref<1x8xf32, #tpu.memory_space<vmem>>, %arg5: memref<1x8xf32, #tpu.memory_space<vmem>>, %arg6: memref<32x8xbf16, #tpu.memory_space<vmem>>) attributes {dimension_semantics = [#tpu.dimension_semantics<arbitrary>], iteration_bounds = array<i64: 1>, scalar_prefetch = 0 : i64, scratch_operands = 0 : i64, tpu.core_type = #tpu.core_type<tc>, window_params = [{pipeline_mode = #tpu.pipeline_mode<synchronous>, transform_indices = @transform_0, window_bounds = array<i64: 32, 36>}, {pipeline_mode = #tpu.pipeline_mode<synchronous>, transform_indices = @transform_1, window_bounds = array<i64: 36, 8>}, {pipeline_mode = #tpu.pipeline_mode<synchronous>, transform_indices = @transform_2, window_bounds = array<i64: 1, 8>}, {pipeline_mode = #tpu.pipeline_mode<synchronous>, transform_indices = @transform_3, window_bounds = array<i64: 1, 8>}, {pipeline_mode = #tpu.pipeline_mode<synchronous>, transform_indices = @transform_4, window_bounds = array<i64: 1, 8>}, {pipeline_mode = #tpu.pipeline_mode<synchronous>, transform_indices = @transform_5, window_bounds = array<i64: 32, 8>}]} {
    %c0 = arith.constant 0 : index
    %c0_0 = arith.constant 0 : index
    %0 = vector.load %arg1[%c0, %c0_0] : memref<32x36xbf16, #tpu.memory_space<vmem>>, vector<32x36xbf16>
    %c0_1 = arith.constant 0 : index
    %c0_2 = arith.constant 0 : index
    %1 = vector.load %arg2[%c0_1, %c0_2] : memref<36x8xbf16, #tpu.memory_space<vmem>>, vector<36x8xbf16>
    %cst = arith.constant dense<0.000000e+00> : vector<32x8xf32>
    %2 = tpu.matmul %0, %1, %cst {dimension_numbers = #tpu.dot_dimension_numbers<[1], [0], [0], [1], [0, 0, 1, 1], [], []>} : vector<32x36xbf16>, vector<36x8xbf16>, vector<32x8xf32> -> vector<32x8xf32>
    %c0_3 = arith.constant 0 : index
    %c0_4 = arith.constant 0 : index
    %3 = vector.load %arg3[%c0_3, %c0_4] : memref<1x8xf32, #tpu.memory_space<vmem>>, vector<1x8xf32>
    %4 = vector.broadcast %3 : vector<1x8xf32> to vector<32x8xf32>
    %5 = arith.addf %2, %4 : vector<32x8xf32>
    %cst_5 = arith.constant dense<0.000000e+00> : vector<8xf32>
    %6 = vector.multi_reduction <add>, %5, %cst_5 [0] : vector<32x8xf32> to vector<8xf32>
    %7 = vector.shape_cast %6 : vector<8xf32> to vector<1x8xf32>
    %cst_6 = arith.constant 3.125000e-02 : f32
    %8 = vector.broadcast %cst_6 : f32 to vector<1x8xf32>
    %9 = arith.mulf %7, %8 : vector<1x8xf32>
    %10 = vector.broadcast %9 : vector<1x8xf32> to vector<32x8xf32>
    %11 = arith.subf %5, %10 : vector<32x8xf32>
    %12 = arith.mulf %11, %11 : vector<32x8xf32>
    %cst_7 = arith.constant dense<0.000000e+00> : vector<8xf32>
    %13 = vector.multi_reduction <add>, %12, %cst_7 [0] : vector<32x8xf32> to vector<8xf32>
    %14 = vector.shape_cast %13 : vector<8xf32> to vector<1x8xf32>
    %cst_8 = arith.constant 3.125000e-02 : f32
    %15 = vector.broadcast %cst_8 : f32 to vector<1x8xf32>
    %16 = arith.mulf %14, %15 : vector<1x8xf32>
    %c0_9 = arith.constant 0 : index
    %c0_10 = arith.constant 0 : index
    %17 = vector.load %arg4[%c0_9, %c0_10] : memref<1x8xf32, #tpu.memory_space<vmem>>, vector<1x8xf32>
    %cst_11 = arith.constant 9.99999974E-6 : f32
    %18 = vector.broadcast %cst_11 : f32 to vector<1x8xf32>
    %19 = arith.addf %16, %18 : vector<1x8xf32>
    %20 = math.rsqrt %19 : vector<1x8xf32>
    %21 = arith.mulf %17, %20 : vector<1x8xf32>
    %22 = vector.broadcast %21 : vector<1x8xf32> to vector<32x8xf32>
    %23 = arith.mulf %11, %22 : vector<32x8xf32>
    %c0_12 = arith.constant 0 : index
    %c0_13 = arith.constant 0 : index
    %24 = vector.load %arg5[%c0_12, %c0_13] : memref<1x8xf32, #tpu.memory_space<vmem>>, vector<1x8xf32>
    %25 = vector.broadcast %24 : vector<1x8xf32> to vector<32x8xf32>
    %26 = arith.addf %23, %25 : vector<32x8xf32>
    %cst_14 = arith.constant 0.000000e+00 : f32
    %27 = vector.broadcast %cst_14 : f32 to vector<32x8xf32>
    %28 = arith.maximumf %26, %27 : vector<32x8xf32>
    %29 = arith.truncf %28 : vector<32x8xf32> to vector<32x8xbf16>
    %c0_15 = arith.constant 0 : index
    %c0_16 = arith.constant 0 : index
    %30 = vector.load %arg6[%c0_15, %c0_16] : memref<32x8xbf16, #tpu.memory_space<vmem>>, vector<32x8xbf16>
    tpu.vector_store %arg6[%c0_15, %c0_16], %29 {strides = array<i32>} : memref<32x8xbf16, #tpu.memory_space<vmem>>, vector<32x8xbf16>,
    return
  }
  func.func @transform_0(%arg0: i32) -> (i32, i32) {
    %c0_i32 = arith.constant 0 : i32
    %c0_i32_0 = arith.constant 0 : i32
    %c0_i32_1 = arith.constant 0 : i32
    return %c0_i32, %c0_i32_0 : i32, i32
  }
  func.func @transform_1(%arg0: i32) -> (i32, i32) {
    %c0_i32 = arith.constant 0 : i32
    %c0_i32_0 = arith.constant 0 : i32
    %c0_i32_1 = arith.constant 0 : i32
    return %c0_i32, %c0_i32_0 : i32, i32
  }
  func.func @transform_2(%arg0: i32) -> (i32, i32) {
    %c0_i32 = arith.constant 0 : i32
    %c0_i32_0 = arith.constant 0 : i32
    %c0_i32_1 = arith.constant 0 : i32
    return %c0_i32, %c0_i32_0 : i32, i32
  }
  func.func @transform_3(%arg0: i32) -> (i32, i32) {
    %c0_i32 = arith.constant 0 : i32
    %c0_i32_0 = arith.constant 0 : i32
    %c0_i32_1 = arith.constant 0 : i32
    return %c0_i32, %c0_i32_0 : i32, i32
  }
  func.func @transform_4(%arg0: i32) -> (i32, i32) {
    %c0_i32 = arith.constant 0 : i32
    %c0_i32_0 = arith.constant 0 : i32
    %c0_i32_1 = arith.constant 0 : i32
    return %c0_i32, %c0_i32_0 : i32, i32
  }
  func.func @transform_5(%arg0: i32) -> (i32, i32) {
    %c0_i32 = arith.constant 0 : i32
    %c0_i32_0 = arith.constant 0 : i32
    %c0_i32_1 = arith.constant 0 : i32
    return %c0_i32, %c0_i32_0 : i32, i32
  }
}

module attributes {stable_mosaic.version = 11 : i64} {
  func.func @_mlp_kernel(%arg0: i32, %arg1: memref<2x128xbf16, #tpu.memory_space<vmem>>, %arg2: memref<128x32xbf16, #tpu.memory_space<vmem>>, %arg3: memref<1x32xf32, #tpu.memory_space<vmem>>, %arg4: memref<32x16xbf16, #tpu.memory_space<vmem>>, %arg5: memref<1x16xf32, #tpu.memory_space<vmem>>, %arg6: memref<16x32xbf16, #tpu.memory_space<vmem>>, %arg7: memref<1x32xf32, #tpu.memory_space<vmem>>, %arg8: memref<32x128xbf16, #tpu.memory_space<vmem>>, %arg9: memref<1x128xf32, #tpu.memory_space<vmem>>, %arg10: memref<2x16xf32, #tpu.memory_space<vmem>>, %arg11: memref<2x128xbf16, #tpu.memory_space<vmem>>) attributes {dimension_semantics = [#tpu.dimension_semantics<arbitrary>], iteration_bounds = array<i64: 1>, scalar_prefetch = 0 : i64, scratch_operands = 0 : i64, tpu.core_type = #tpu.core_type<tc>, window_params = [{pipeline_mode = #tpu.pipeline_mode<synchronous>, transform_indices = @transform_0, window_bounds = array<i64: 2, 128>}, {pipeline_mode = #tpu.pipeline_mode<synchronous>, transform_indices = @transform_1, window_bounds = array<i64: 128, 32>}, {pipeline_mode = #tpu.pipeline_mode<synchronous>, transform_indices = @transform_2, window_bounds = array<i64: 1, 32>}, {pipeline_mode = #tpu.pipeline_mode<synchronous>, transform_indices = @transform_3, window_bounds = array<i64: 32, 16>}, {pipeline_mode = #tpu.pipeline_mode<synchronous>, transform_indices = @transform_4, window_bounds = array<i64: 1, 16>}, {pipeline_mode = #tpu.pipeline_mode<synchronous>, transform_indices = @transform_5, window_bounds = array<i64: 16, 32>}, {pipeline_mode = #tpu.pipeline_mode<synchronous>, transform_indices = @transform_6, window_bounds = array<i64: 1, 32>}, {pipeline_mode = #tpu.pipeline_mode<synchronous>, transform_indices = @transform_7, window_bounds = array<i64: 32, 128>}, {pipeline_mode = #tpu.pipeline_mode<synchronous>, transform_indices = @transform_8, window_bounds = array<i64: 1, 128>}, {pipeline_mode = #tpu.pipeline_mode<synchronous>, transform_indices = @transform_9, window_bounds = array<i64: 2, 16>}, {pipeline_mode = #tpu.pipeline_mode<synchronous>, transform_indices = @transform_10, window_bounds = array<i64: 2, 128>}]} {
    %c0 = arith.constant 0 : index
    %c0_0 = arith.constant 0 : index
    %0 = vector.load %arg1[%c0, %c0_0] : memref<2x128xbf16, #tpu.memory_space<vmem>>, vector<2x128xbf16>
    %c0_1 = arith.constant 0 : index
    %c0_2 = arith.constant 0 : index
    %1 = vector.load %arg2[%c0_1, %c0_2] : memref<128x32xbf16, #tpu.memory_space<vmem>>, vector<128x32xbf16>
    %cst = arith.constant dense<0.000000e+00> : vector<2x32xf32>
    %2 = tpu.matmul %0, %1, %cst {dimension_numbers = #tpu.dot_dimension_numbers<[1], [0], [0], [1], [0, 0, 1, 1], [], []>} : vector<2x128xbf16>, vector<128x32xbf16>, vector<2x32xf32> -> vector<2x32xf32>
    %c0_3 = arith.constant 0 : index
    %c0_4 = arith.constant 0 : index
    %3 = vector.load %arg3[%c0_3, %c0_4] : memref<1x32xf32, #tpu.memory_space<vmem>>, vector<1x32xf32>
    %4 = vector.broadcast %3 : vector<1x32xf32> to vector<2x32xf32>
    %5 = arith.addf %2, %4 : vector<2x32xf32>
    %cst_5 = arith.constant 0.000000e+00 : f32
    %6 = vector.broadcast %cst_5 : f32 to vector<2x32xf32>
    %7 = arith.maximumf %5, %6 : vector<2x32xf32>
    %8 = arith.truncf %7 : vector<2x32xf32> to vector<2x32xbf16>
    %c0_6 = arith.constant 0 : index
    %c0_7 = arith.constant 0 : index
    %9 = vector.load %arg4[%c0_6, %c0_7] : memref<32x16xbf16, #tpu.memory_space<vmem>>, vector<32x16xbf16>
    %cst_8 = arith.constant dense<0.000000e+00> : vector<2x16xf32>
    %10 = tpu.matmul %8, %9, %cst_8 {dimension_numbers = #tpu.dot_dimension_numbers<[1], [0], [0], [1], [0, 0, 1, 1], [], []>} : vector<2x32xbf16>, vector<32x16xbf16>, vector<2x16xf32> -> vector<2x16xf32>
    %c0_9 = arith.constant 0 : index
    %c0_10 = arith.constant 0 : index
    %11 = vector.load %arg5[%c0_9, %c0_10] : memref<1x16xf32, #tpu.memory_space<vmem>>, vector<1x16xf32>
    %12 = vector.broadcast %11 : vector<1x16xf32> to vector<2x16xf32>
    %13 = arith.addf %10, %12 : vector<2x16xf32>
    %c0_11 = arith.constant 0 : index
    %c0_12 = arith.constant 0 : index
    %14 = vector.load %arg10[%c0_11, %c0_12] : memref<2x16xf32, #tpu.memory_space<vmem>>, vector<2x16xf32>
    tpu.vector_store %arg10[%c0_11, %c0_12], %13 {strides = array<i32>} : memref<2x16xf32, #tpu.memory_space<vmem>>, vector<2x16xf32>,
    %15 = arith.truncf %13 : vector<2x16xf32> to vector<2x16xbf16>
    %c0_13 = arith.constant 0 : index
    %c0_14 = arith.constant 0 : index
    %16 = vector.load %arg6[%c0_13, %c0_14] : memref<16x32xbf16, #tpu.memory_space<vmem>>, vector<16x32xbf16>
    %cst_15 = arith.constant dense<0.000000e+00> : vector<2x32xf32>
    %17 = tpu.matmul %15, %16, %cst_15 {dimension_numbers = #tpu.dot_dimension_numbers<[1], [0], [0], [1], [0, 0, 1, 1], [], []>} : vector<2x16xbf16>, vector<16x32xbf16>, vector<2x32xf32> -> vector<2x32xf32>
    %c0_16 = arith.constant 0 : index
    %c0_17 = arith.constant 0 : index
    %18 = vector.load %arg7[%c0_16, %c0_17] : memref<1x32xf32, #tpu.memory_space<vmem>>, vector<1x32xf32>
    %19 = vector.broadcast %18 : vector<1x32xf32> to vector<2x32xf32>
    %20 = arith.addf %17, %19 : vector<2x32xf32>
    %cst_18 = arith.constant 0.000000e+00 : f32
    %21 = vector.broadcast %cst_18 : f32 to vector<2x32xf32>
    %22 = arith.maximumf %20, %21 : vector<2x32xf32>
    %23 = arith.truncf %22 : vector<2x32xf32> to vector<2x32xbf16>
    %c0_19 = arith.constant 0 : index
    %c0_20 = arith.constant 0 : index
    %24 = vector.load %arg8[%c0_19, %c0_20] : memref<32x128xbf16, #tpu.memory_space<vmem>>, vector<32x128xbf16>
    %cst_21 = arith.constant dense<0.000000e+00> : vector<2x128xf32>
    %25 = tpu.matmul %23, %24, %cst_21 {dimension_numbers = #tpu.dot_dimension_numbers<[1], [0], [0], [1], [0, 0, 1, 1], [], []>} : vector<2x32xbf16>, vector<32x128xbf16>, vector<2x128xf32> -> vector<2x128xf32>
    %c0_22 = arith.constant 0 : index
    %c0_23 = arith.constant 0 : index
    %26 = vector.load %arg9[%c0_22, %c0_23] : memref<1x128xf32, #tpu.memory_space<vmem>>, vector<1x128xf32>
    %27 = vector.broadcast %26 : vector<1x128xf32> to vector<2x128xf32>
    %28 = arith.addf %25, %27 : vector<2x128xf32>
    %cst_24 = arith.constant 0.000000e+00 : f32
    %29 = vector.broadcast %cst_24 : f32 to vector<2x128xf32>
    %30 = arith.maximumf %28, %29 : vector<2x128xf32>
    %31 = arith.truncf %30 : vector<2x128xf32> to vector<2x128xbf16>
    %c0_25 = arith.constant 0 : index
    %c0_26 = arith.constant 0 : index
    %32 = vector.load %arg11[%c0_25, %c0_26] : memref<2x128xbf16, #tpu.memory_space<vmem>>, vector<2x128xbf16>
    tpu.vector_store %arg11[%c0_25, %c0_26], %31 {strides = array<i32>} : memref<2x128xbf16, #tpu.memory_space<vmem>>, vector<2x128xbf16>,
    return
  }
  func.func @transform_0(%arg0: i32) -> (i32, i32) {
    %c0_i32 = arith.constant 0 : i32
    %c0_i32_0 = arith.constant 0 : i32
    %c0_i32_1 = arith.constant 0 : i32
    return %c0_i32, %c0_i32_0 : i32, i32
  }
  func.func @transform_1(%arg0: i32) -> (i32, i32) {
    %c0_i32 = arith.constant 0 : i32
    %c0_i32_0 = arith.constant 0 : i32
    %c0_i32_1 = arith.constant 0 : i32
    return %c0_i32, %c0_i32_0 : i32, i32
  }
  func.func @transform_2(%arg0: i32) -> (i32, i32) {
    %c0_i32 = arith.constant 0 : i32
    %c0_i32_0 = arith.constant 0 : i32
    %c0_i32_1 = arith.constant 0 : i32
    return %c0_i32, %c0_i32_0 : i32, i32
  }
  func.func @transform_3(%arg0: i32) -> (i32, i32) {
    %c0_i32 = arith.constant 0 : i32
    %c0_i32_0 = arith.constant 0 : i32
    %c0_i32_1 = arith.constant 0 : i32
    return %c0_i32, %c0_i32_0 : i32, i32
  }
  func.func @transform_4(%arg0: i32) -> (i32, i32) {
    %c0_i32 = arith.constant 0 : i32
    %c0_i32_0 = arith.constant 0 : i32
    %c0_i32_1 = arith.constant 0 : i32
    return %c0_i32, %c0_i32_0 : i32, i32
  }
  func.func @transform_5(%arg0: i32) -> (i32, i32) {
    %c0_i32 = arith.constant 0 : i32
    %c0_i32_0 = arith.constant 0 : i32
    %c0_i32_1 = arith.constant 0 : i32
    return %c0_i32, %c0_i32_0 : i32, i32
  }
  func.func @transform_6(%arg0: i32) -> (i32, i32) {
    %c0_i32 = arith.constant 0 : i32
    %c0_i32_0 = arith.constant 0 : i32
    %c0_i32_1 = arith.constant 0 : i32
    return %c0_i32, %c0_i32_0 : i32, i32
  }
  func.func @transform_7(%arg0: i32) -> (i32, i32) {
    %c0_i32 = arith.constant 0 : i32
    %c0_i32_0 = arith.constant 0 : i32
    %c0_i32_1 = arith.constant 0 : i32
    return %c0_i32, %c0_i32_0 : i32, i32
  }
  func.func @transform_8(%arg0: i32) -> (i32, i32) {
    %c0_i32 = arith.constant 0 : i32
    %c0_i32_0 = arith.constant 0 : i32
    %c0_i32_1 = arith.constant 0 : i32
    return %c0_i32, %c0_i32_0 : i32, i32
  }
  func.func @transform_9(%arg0: i32) -> (i32, i32) {
    %c0_i32 = arith.constant 0 : i32
    %c0_i32_0 = arith.constant 0 : i32
    %c0_i32_1 = arith.constant 0 : i32
    return %c0_i32, %c0_i32_0 : i32, i32
  }
  func.func @transform_10(%arg0: i32) -> (i32, i32) {
    %c0_i32 = arith.constant 0 : i32
    %c0_i32_0 = arith.constant 0 : i32
    %c0_i32_1 = arith.constant 0 : i32
    return %c0_i32, %c0_i32_0 : i32, i32
  }
}

module attributes {stable_mosaic.version = 11 : i64} {
  func.func @_deconv_bn_relu_kernel(%arg0: i32, %arg1: memref<32x32xbf16, #tpu.memory_space<vmem>>, %arg2: memref<32x16xbf16, #tpu.memory_space<vmem>>, %arg3: memref<1x16xf32, #tpu.memory_space<vmem>>, %arg4: memref<1x16xf32, #tpu.memory_space<vmem>>, %arg5: memref<1x16xf32, #tpu.memory_space<vmem>>, %arg6: memref<16x16xf32, #tpu.memory_space<vmem>>, %arg7: memref<32x16xbf16, #tpu.memory_space<vmem>>) attributes {dimension_semantics = [#tpu.dimension_semantics<arbitrary>], iteration_bounds = array<i64: 1>, scalar_prefetch = 0 : i64, scratch_operands = 0 : i64, tpu.core_type = #tpu.core_type<tc>, window_params = [{pipeline_mode = #tpu.pipeline_mode<synchronous>, transform_indices = @transform_0, window_bounds = array<i64: 32, 32>}, {pipeline_mode = #tpu.pipeline_mode<synchronous>, transform_indices = @transform_1, window_bounds = array<i64: 32, 16>}, {pipeline_mode = #tpu.pipeline_mode<synchronous>, transform_indices = @transform_2, window_bounds = array<i64: 1, 16>}, {pipeline_mode = #tpu.pipeline_mode<synchronous>, transform_indices = @transform_3, window_bounds = array<i64: 1, 16>}, {pipeline_mode = #tpu.pipeline_mode<synchronous>, transform_indices = @transform_4, window_bounds = array<i64: 1, 16>}, {pipeline_mode = #tpu.pipeline_mode<synchronous>, transform_indices = @transform_5, window_bounds = array<i64: 16, 16>}, {pipeline_mode = #tpu.pipeline_mode<synchronous>, transform_indices = @transform_6, window_bounds = array<i64: 32, 16>}]} {
    %c0 = arith.constant 0 : index
    %c0_0 = arith.constant 0 : index
    %0 = vector.load %arg1[%c0, %c0_0] : memref<32x32xbf16, #tpu.memory_space<vmem>>, vector<32x32xbf16>
    %c0_1 = arith.constant 0 : index
    %c0_2 = arith.constant 0 : index
    %1 = vector.load %arg2[%c0_1, %c0_2] : memref<32x16xbf16, #tpu.memory_space<vmem>>, vector<32x16xbf16>
    %cst = arith.constant dense<0.000000e+00> : vector<32x16xf32>
    %2 = tpu.matmul %0, %1, %cst {dimension_numbers = #tpu.dot_dimension_numbers<[1], [0], [0], [1], [0, 0, 1, 1], [], []>} : vector<32x32xbf16>, vector<32x16xbf16>, vector<32x16xf32> -> vector<32x16xf32>
    %c0_3 = arith.constant 0 : index
    %c0_4 = arith.constant 0 : index
    %3 = vector.load %arg3[%c0_3, %c0_4] : memref<1x16xf32, #tpu.memory_space<vmem>>, vector<1x16xf32>
    %4 = vector.broadcast %3 : vector<1x16xf32> to vector<32x16xf32>
    %5 = arith.addf %2, %4 : vector<32x16xf32>
    %c0_5 = arith.constant 0 : index
    %c0_6 = arith.constant 0 : index
    %6 = vector.load %arg6[%c0_5, %c0_6] : memref<16x16xf32, #tpu.memory_space<vmem>>, vector<16x16xf32>
    %cst_7 = arith.constant dense<0.000000e+00> : vector<32x16xf32>
    %7 = tpu.matmul %5, %6, %cst_7 {dimension_numbers = #tpu.dot_dimension_numbers<[1], [0], [0], [1], [0, 0, 1, 1], [], []>} : vector<32x16xf32>, vector<16x16xf32>, vector<32x16xf32> -> vector<32x16xf32>
    %cst_8 = arith.constant dense<0.000000e+00> : vector<16xf32>
    %8 = vector.multi_reduction <add>, %7, %cst_8 [0] : vector<32x16xf32> to vector<16xf32>
    %9 = vector.shape_cast %8 : vector<16xf32> to vector<1x16xf32>
    %cst_9 = arith.constant 7.812500e-03 : f32
    %10 = vector.broadcast %cst_9 : f32 to vector<1x16xf32>
    %11 = arith.mulf %9, %10 : vector<1x16xf32>
    %12 = vector.broadcast %11 : vector<1x16xf32> to vector<32x16xf32>
    %13 = arith.subf %5, %12 : vector<32x16xf32>
    %14 = arith.mulf %13, %13 : vector<32x16xf32>
    %cst_10 = arith.constant dense<0.000000e+00> : vector<32x16xf32>
    %15 = tpu.matmul %14, %6, %cst_10 {dimension_numbers = #tpu.dot_dimension_numbers<[1], [0], [0], [1], [0, 0, 1, 1], [], []>} : vector<32x16xf32>, vector<16x16xf32>, vector<32x16xf32> -> vector<32x16xf32>
    %cst_11 = arith.constant dense<0.000000e+00> : vector<16xf32>
    %16 = vector.multi_reduction <add>, %15, %cst_11 [0] : vector<32x16xf32> to vector<16xf32>
    %17 = vector.shape_cast %16 : vector<16xf32> to vector<1x16xf32>
    %cst_12 = arith.constant 7.812500e-03 : f32
    %18 = vector.broadcast %cst_12 : f32 to vector<1x16xf32>
    %19 = arith.mulf %17, %18 : vector<1x16xf32>
    %c0_13 = arith.constant 0 : index
    %c0_14 = arith.constant 0 : index
    %20 = vector.load %arg4[%c0_13, %c0_14] : memref<1x16xf32, #tpu.memory_space<vmem>>, vector<1x16xf32>
    %cst_15 = arith.constant 9.99999974E-6 : f32
    %21 = vector.broadcast %cst_15 : f32 to vector<1x16xf32>
    %22 = arith.addf %19, %21 : vector<1x16xf32>
    %23 = math.rsqrt %22 : vector<1x16xf32>
    %24 = arith.mulf %20, %23 : vector<1x16xf32>
    %25 = vector.broadcast %24 : vector<1x16xf32> to vector<32x16xf32>
    %26 = arith.mulf %13, %25 : vector<32x16xf32>
    %c0_16 = arith.constant 0 : index
    %c0_17 = arith.constant 0 : index
    %27 = vector.load %arg5[%c0_16, %c0_17] : memref<1x16xf32, #tpu.memory_space<vmem>>, vector<1x16xf32>
    %28 = vector.broadcast %27 : vector<1x16xf32> to vector<32x16xf32>
    %29 = arith.addf %26, %28 : vector<32x16xf32>
    %cst_18 = arith.constant 0.000000e+00 : f32
    %30 = vector.broadcast %cst_18 : f32 to vector<32x16xf32>
    %31 = arith.maximumf %29, %30 : vector<32x16xf32>
    %32 = arith.truncf %31 : vector<32x16xf32> to vector<32x16xbf16>
    %c0_19 = arith.constant 0 : index
    %c0_20 = arith.constant 0 : index
    %33 = vector.load %arg7[%c0_19, %c0_20] : memref<32x16xbf16, #tpu.memory_space<vmem>>, vector<32x16xbf16>
    tpu.vector_store %arg7[%c0_19, %c0_20], %32 {strides = array<i32>} : memref<32x16xbf16, #tpu.memory_space<vmem>>, vector<32x16xbf16>,
    return
  }
  func.func @transform_0(%arg0: i32) -> (i32, i32) {
    %c0_i32 = arith.constant 0 : i32
    %c0_i32_0 = arith.constant 0 : i32
    %c0_i32_1 = arith.constant 0 : i32
    return %c0_i32, %c0_i32_0 : i32, i32
  }
  func.func @transform_1(%arg0: i32) -> (i32, i32) {
    %c0_i32 = arith.constant 0 : i32
    %c0_i32_0 = arith.constant 0 : i32
    %c0_i32_1 = arith.constant 0 : i32
    return %c0_i32, %c0_i32_0 : i32, i32
  }
  func.func @transform_2(%arg0: i32) -> (i32, i32) {
    %c0_i32 = arith.constant 0 : i32
    %c0_i32_0 = arith.constant 0 : i32
    %c0_i32_1 = arith.constant 0 : i32
    return %c0_i32, %c0_i32_0 : i32, i32
  }
  func.func @transform_3(%arg0: i32) -> (i32, i32) {
    %c0_i32 = arith.constant 0 : i32
    %c0_i32_0 = arith.constant 0 : i32
    %c0_i32_1 = arith.constant 0 : i32
    return %c0_i32, %c0_i32_0 : i32, i32
  }
  func.func @transform_4(%arg0: i32) -> (i32, i32) {
    %c0_i32 = arith.constant 0 : i32
    %c0_i32_0 = arith.constant 0 : i32
    %c0_i32_1 = arith.constant 0 : i32
    return %c0_i32, %c0_i32_0 : i32, i32
  }
  func.func @transform_5(%arg0: i32) -> (i32, i32) {
    %c0_i32 = arith.constant 0 : i32
    %c0_i32_0 = arith.constant 0 : i32
    %c0_i32_1 = arith.constant 0 : i32
    return %c0_i32, %c0_i32_0 : i32, i32
  }
  func.func @transform_6(%arg0: i32) -> (i32, i32) {
    %c0_i32 = arith.constant 0 : i32
    %c0_i32_0 = arith.constant 0 : i32
    %c0_i32_1 = arith.constant 0 : i32
    return %c0_i32, %c0_i32_0 : i32, i32
  }
}

module attributes {stable_mosaic.version = 11 : i64} {
  func.func @_deconv_sigmoid_kernel(%arg0: i32, %arg1: memref<128x16xbf16, #tpu.memory_space<vmem>>, %arg2: memref<16x4xbf16, #tpu.memory_space<vmem>>, %arg3: memref<1x4xf32, #tpu.memory_space<vmem>>, %arg4: memref<128x4xf32, #tpu.memory_space<vmem>>) attributes {dimension_semantics = [#tpu.dimension_semantics<parallel>], iteration_bounds = array<i64: 1>, scalar_prefetch = 0 : i64, scratch_operands = 0 : i64, tpu.core_type = #tpu.core_type<tc>, window_params = [{transform_indices = @transform_0, window_bounds = array<i64: 128, 16>}, {pipeline_mode = #tpu.pipeline_mode<synchronous>, transform_indices = @transform_1, window_bounds = array<i64: 16, 4>}, {pipeline_mode = #tpu.pipeline_mode<synchronous>, transform_indices = @transform_2, window_bounds = array<i64: 1, 4>}, {transform_indices = @transform_3, window_bounds = array<i64: 128, 4>}]} {
    %c0 = arith.constant 0 : index
    %c0_0 = arith.constant 0 : index
    %0 = vector.load %arg1[%c0, %c0_0] : memref<128x16xbf16, #tpu.memory_space<vmem>>, vector<128x16xbf16>
    %c0_1 = arith.constant 0 : index
    %c0_2 = arith.constant 0 : index
    %1 = vector.load %arg2[%c0_1, %c0_2] : memref<16x4xbf16, #tpu.memory_space<vmem>>, vector<16x4xbf16>
    %cst = arith.constant dense<0.000000e+00> : vector<128x4xf32>
    %2 = tpu.matmul %0, %1, %cst {dimension_numbers = #tpu.dot_dimension_numbers<[1], [0], [0], [1], [0, 0, 1, 1], [], []>} : vector<128x16xbf16>, vector<16x4xbf16>, vector<128x4xf32> -> vector<128x4xf32>
    %c0_3 = arith.constant 0 : index
    %c0_4 = arith.constant 0 : index
    %3 = vector.load %arg3[%c0_3, %c0_4] : memref<1x4xf32, #tpu.memory_space<vmem>>, vector<1x4xf32>
    %4 = vector.broadcast %3 : vector<1x4xf32> to vector<128x4xf32>
    %5 = arith.addf %2, %4 : vector<128x4xf32>
    %6 = arith.negf %5 : vector<128x4xf32>
    %7 = math.exp %6 : vector<128x4xf32>
    %cst_5 = arith.constant 1.000000e+00 : f32
    %8 = vector.broadcast %cst_5 : f32 to vector<128x4xf32>
    %9 = arith.addf %8, %7 : vector<128x4xf32>
    %10 = arith.divf %8, %9 : vector<128x4xf32>
    %c0_6 = arith.constant 0 : index
    %c0_7 = arith.constant 0 : index
    %11 = vector.load %arg4[%c0_6, %c0_7] : memref<128x4xf32, #tpu.memory_space<vmem>>, vector<128x4xf32>
    tpu.vector_store %arg4[%c0_6, %c0_7], %10 {strides = array<i32>} : memref<128x4xf32, #tpu.memory_space<vmem>>, vector<128x4xf32>,
    return
  }
  func.func @transform_0(%arg0: i32) -> (i32, i32) {
    %c0_i32 = arith.constant 0 : i32
    %c0_i32_0 = arith.constant 0 : i32
    return %arg0, %c0_i32 : i32, i32
  }
  func.func @transform_1(%arg0: i32) -> (i32, i32) {
    %c0_i32 = arith.constant 0 : i32
    %c0_i32_0 = arith.constant 0 : i32
    %c0_i32_1 = arith.constant 0 : i32
    return %c0_i32, %c0_i32_0 : i32, i32
  }
  func.func @transform_2(%arg0: i32) -> (i32, i32) {
    %c0_i32 = arith.constant 0 : i32
    %c0_i32_0 = arith.constant 0 : i32
    %c0_i32_1 = arith.constant 0 : i32
    return %c0_i32, %c0_i32_0 : i32, i32
  }
  func.func @transform_3(%arg0: i32) -> (i32, i32) {
    %c0_i32 = arith.constant 0 : i32
    %c0_i32_0 = arith.constant 0 : i32
    return %arg0, %c0_i32 : i32, i32
  }
}

</mosaic_0001>

<bundles_post_ra>
// kernel: cae_forward.5
= control target key start
LH: loop header
LB: loop body
LE: loop exit
PB: predicated region body
PF: predicated region fallthrough
CT: control target
= control target key end

     0   :  { %vm116_vm0 = vcmask 1043456   ;;  %vm117_vm1 = vcmask 1044480   ;;  %vm91_vm2 = vcmask 72704   ;;  %v571_v1 = vmov 65535   ;;  %s830_s1 = inlined_call_operand.vmem [shape: bf16[9,4], index: 1, kind: input, shape index: {}]   ;;  %s831_s0 = inlined_call_operand.vmem [shape: bf16[128,9], index: 0, kind: input, shape index: {}]   ;;  %s832_s2 = inlined_call_operand.vmem [shape: f32[1,4], index: 2, kind: input, shape index: {}]   ;;  %s833_s3 = inlined_call_operand.vmem [shape: f32[1,4], index: 3, kind: input, shape index: {}]   ;;  %s834_s4 = inlined_call_operand.vmem [shape: f32[1,4], index: 4, kind: input, shape index: {}]   ;;  %s835_s5 = inlined_call_operand.vmem [shape: bf16[128,4], index: 5, kind: output, shape index: {}]  }
   0x1   :  { %v560_v0 = vld [vmem:[%s830_s1] sm:$0x1f]   ;;  %v118_v2 = vsel %vm116_vm0, 4294967295, %v571_v1  ;;  %v562_v6 = vld [vmem:[%s831_s0 + $0x8] sm:$0xff]   ;;  %v563_v7 = vld [vmem:[%s831_s0 + $0x10] sm:$0xff]   ;;  %vm220_vm3 = vcmask 31744  }
   0x2   :  { %v561_v3 = vld [vmem:[%s831_s0] sm:$0xff]   ;;  %v119_v4 = vsel %vm117_vm1, %v118_v2, 0  ;;  %v566_v9 = vld [vmem:[%s831_s0 + $0x28] sm:$0xff]   ;;  %v567_v10 = vld [vmem:[%s831_s0 + $0x30] sm:$0xff]   ;;  %vm458_vm4 = vcmask 27648  }
   0x3   :  { %v121_v5 = vand.u32 %v560_v0, %v119_v4  ;;  %541 = vmatprep.mubr.msk.bf16.mxu0 %vm91_vm2, %v561_v3  ;;  %v565_v8 = vld [vmem:[%s831_s0 + $0x20] sm:$0xff]   ;;  %v564_v11 = vld [vmem:[%s831_s0 + $0x18] sm:$0xff]  }
   0x4   :  { %549 = vmatprep.mubr.msk.bf16.mxu1 %vm91_vm2, %v565_v8  ;;  %v568_v12 = vld [vmem:[%s831_s0 + $0x38] sm:$0xff]   ;;  %v479_v13 = vld [vmem:[%s832_s2] ss:$0 sm:$0xff] }
   0x5   :  { %539 = vmatprep.subr.bf16.mxu0 %v121_v5  ;;  %557 = vmatprep.subr.bf16.mxu1 %v121_v5 }
   0x6   :  { %540 = vmatpush3.bf16.msra.mxu0 %v121_v5  ;;  %558 = vmatpush3.bf16.msra.mxu1 %v121_v5 }
   0x9   :  { %542 = vmatmul.mubr.msk.bf16.vlgmr.msra.gmra.mrb[0].mxu0 %vm91_vm2, %v562_v6  ;;  %550 = vmatmul.mubr.msk.bf16.vlgmr.msra.gmra.mrb[0].mxu1 %vm91_vm2, %v566_v9 }
   0xa   :  { %545 = vmatprep.mubr.msk.bf16.mxu0 %vm91_vm2, %v563_v7  ;;  %553 = vmatprep.mubr.msk.bf16.mxu1 %vm91_vm2, %v567_v10 }
  0x11   :  { %546 = vmatmul.mubr.msk.bf16.gmra.mrb[4].mxu0 %vm91_vm2, %v564_v11  ;;  %554 = vmatmul.mubr.msk.bf16.gmra.mrb[4].mxu1 %vm91_vm2, %v568_v12 }
  0xdc   :  { %v543_v14 = vpop.f32.mrb[0].mxu0  ;;  %v551_v15 = vpop.f32.mrb[0].mxu1 }
  0xdd   :  { %v157_v16 = vpop.f32.mrb[1].mxu0  ;;  %v189_v17 = vpop.f32.mrb[1].mxu1  ;;  %v642_v23 = vadd.f32 %v543_v14, %v479_v13  ;;  %v198_v56 = vadd.f32 %v551_v15, %v479_v13 }
  0xde   :  { %v640_v18 = vadd.f32 %v479_v13, %v157_v16  ;;  %v544_v19 = vpop.f32.mrb[2].mxu0  ;;  %v552_v20 = vpop.f32.mrb[2].mxu1  ;;  %v190_v48 = vadd.f32 %v479_v13, %v189_v17 }
  0xdf   :  { %v160_v21 = vpop.f32.mrb[3].mxu0  ;;  %v192_v22 = vpop.f32.mrb[3].mxu1  ;;  %v169_v26 = vadd.f32 %v544_v19, %v479_v13  ;;  %v224_v29 = vsel %vm220_vm3, %v642_v23, 0.0  ;;  %v201_v58 = vadd.f32 %v552_v20, %v479_v13  ;;  %v240_v62 = vsel %vm220_vm3, %v198_v56, 0.0 }
  0xe0   :  { %v161_v24 = vadd.f32 %v479_v13, %v160_v21  ;;  %v221_v25 = vsel %vm220_vm3, %v640_v18, 0.0  ;;  %v236_v53 = vsel %vm220_vm3, %v190_v48, 0.0  ;;  %v193_v54 = vadd.f32 %v479_v13, %v192_v22 }
  0xe1   :  { %v226_v35 = vsel %vm220_vm3, %v169_v26, 0.0  ;;  %v242_v0 = vsel %vm220_vm3, %v201_v58, 0.0 }
  0xe2   :  { %v222_v27 = vsel %vm220_vm3, %v161_v24, 0.0  ;;  %v238_v59 = vsel %vm220_vm3, %v193_v54, 0.0 }
  0xe3   :  { %v223_v28 = vadd.f32 %v222_v27, %v221_v25 }
  0xe4   :  { %v547_v30 = vpop.f32.mrb[4].mxu0  ;;  %v555_v31 = vpop.f32.mrb[4].mxu1 }
  0xe5   :  { %v225_v32 = vadd.f32 %v224_v29, %v223_v28  ;;  %v173_v33 = vpop.f32.mrb[5].mxu0  ;;  %v205_v34 = vpop.f32.mrb[5].mxu1  ;;  %v182_v42 = vadd.f32 %v547_v30, %v479_v13  ;;  %v214_v4 = vadd.f32 %v555_v31, %v479_v13 }
  0xe6   :  { %v174_v36 = vadd.f32 %v479_v13, %v173_v33  ;;  %v548_v37 = vpop.f32.mrb[6].mxu0  ;;  %v556_v38 = vpop.f32.mrb[6].mxu1  ;;  %v206_v60 = vadd.f32 %v479_v13, %v205_v34 }
  0xe7   :  { %v227_v39 = vadd.f32 %v226_v35, %v225_v32  ;;  %v176_v40 = vpop.f32.mrb[7].mxu0  ;;  %v208_v41 = vpop.f32.mrb[7].mxu1  ;;  %v185_v46 = vadd.f32 %v548_v37, %v479_v13  ;;  %v232_v50 = vsel %vm220_vm3, %v182_v42, 0.0  ;;  %v217_v6 = vadd.f32 %v556_v38, %v479_v13 }
  0xe8   :  { %v228_v43 = vsel %vm220_vm3, %v174_v36, 0.0  ;;  %v177_v44 = vadd.f32 %v479_v13, %v176_v40  ;;  %v244_v1 = vsel %vm220_vm3, %v206_v60, 0.0  ;;  %v209_v2 = vadd.f32 %v479_v13, %v208_v41 }
  0xe9   :  { %v229_v45 = vadd.f32 %v228_v43, %v227_v39  ;;  %v234_v52 = vsel %vm220_vm3, %v185_v46, 0.0  ;;  %v248_v9 = vsel %vm220_vm3, %v214_v4, 0.0  ;;  %v250_v11 = vsel %vm220_vm3, %v217_v6, 0.0 }
  0xea   :  { %v230_v47 = vsel %vm220_vm3, %v177_v44, 0.0  ;;  %v246_v7 = vsel %vm220_vm3, %v209_v2, 0.0 }
  0xeb   :  { %v231_v49 = vadd.f32 %v230_v47, %v229_v45 }
  0xed   :  { %v233_v51 = vadd.f32 %v232_v50, %v231_v49 }
  0xef   :  { %v235_v55 = vadd.f32 %v234_v52, %v233_v51 }
  0xf1   :  { %v237_v57 = vadd.f32 %v236_v53, %v235_v55 }
  0xf3   :  { %v239_v61 = vadd.f32 %v238_v59, %v237_v57 }
  0xf5   :  { %v241_v63 = vadd.f32 %v240_v62, %v239_v61 }
  0xf7   :  { %v243_v3 = vadd.f32 %v242_v0, %v241_v63 }
  0xf9   :  { %v245_v5 = vadd.f32 %v244_v1, %v243_v3 }
  0xfb   :  { %v247_v8 = vadd.f32 %v246_v7, %v245_v5 }
  0xfd   :  { %v249_v10 = vadd.f32 %v248_v9, %v247_v8 }
  0xff   :  { %v251_v12 = vadd.f32 %v250_v11, %v249_v10 }
 0x101   :  { %v252_v14 = vrot.slane %v251_v12, 4 }
 0x103   :  { %v253_v15 = vadd.f32 %v252_v14, %v251_v12 }
 0x105   :  { %v254_v16 = vrot.slane %v253_v15, 2 }
 0x107   :  { %v255_v17 = vadd.f32 %v254_v16, %v253_v15 }
 0x109   :  { %v256_v19 = vrot.slane %v255_v17, 1 }
 0x10b   :  { %v257_v20 = vadd.f32 %v256_v19, %v255_v17 }
 0x10d   :  { %v258_v21 = vmul.f32 0.0078125, %v257_v20 }
 0x10f   :  { %v663_v22 = vsub.f32 %v640_v18, %v258_v21  ;;  %v665_v13 = vsub.f32 %v161_v24, %v258_v21  ;;  %v668_v25 = vsub.f32 %v642_v23, %v258_v21  ;;  %v670_v27 = vsub.f32 %v169_v26, %v258_v21 }
 0x110   :  { %v672_v28 = vsub.f32 %v174_v36, %v258_v21  ;;  %v674_v29 = vsub.f32 %v177_v44, %v258_v21  ;;  %v676_v30 = vsub.f32 %v182_v42, %v258_v21  ;;  %v678_v31 = vsub.f32 %v185_v46, %v258_v21 }
 0x111   :  { %v680_v32 = vsub.f32 %v190_v48, %v258_v21  ;;  %v682_v33 = vsub.f32 %v193_v54, %v258_v21  ;;  %v684_v18 = vsub.f32 %v198_v56, %v258_v21  ;;  %v686_v24 = vsub.f32 %v201_v58, %v258_v21 }
 0x112   :  { %v688_v23 = vsub.f32 %v206_v60, %v258_v21  ;;  %v690_v26 = vsub.f32 %v209_v2, %v258_v21  ;;  %v692_v34 = vsub.f32 %v214_v4, %v258_v21  ;;  %v694_v35 = vsub.f32 %v217_v6, %v258_v21 }
 0x113   :  { %v275_v36 = vmul.f32 %v663_v22, %v663_v22  ;;  %v276_v37 = vmul.f32 %v665_v13, %v665_v13  ;;  %v277_v38 = vmul.f32 %v668_v25, %v668_v25  ;;  %v284_v39 = vmul.f32 %v682_v33, %v682_v33 }
 0x114   :  { %v285_v40 = vmul.f32 %v684_v18, %v684_v18  ;;  %v278_v41 = vmul.f32 %v670_v27, %v670_v27  ;;  %v286_v42 = vmul.f32 %v686_v24, %v686_v24  ;;  %v287_v43 = vmul.f32 %v688_v23, %v688_v23 }
 0x115   :  { %v288_v44 = vmul.f32 %v690_v26, %v690_v26  ;;  %v289_v45 = vmul.f32 %v692_v34, %v692_v34  ;;  %v290_v46 = vmul.f32 %v694_v35, %v694_v35  ;;  %v291_v47 = vsel %vm220_vm3, %v275_v36, 0.0 }
 0x116   :  { %v292_v48 = vsel %vm220_vm3, %v276_v37, 0.0  ;;  %v279_v50 = vmul.f32 %v672_v28, %v672_v28  ;;  %v294_v51 = vsel %vm220_vm3, %v277_v38, 0.0  ;;  %v308_v52 = vsel %vm220_vm3, %v284_v39, 0.0 }
 0x117   :  { %v293_v49 = vadd.f32 %v292_v48, %v291_v47  ;;  %v310_v53 = vsel %vm220_vm3, %v285_v40, 0.0  ;;  %v312_v55 = vsel %vm220_vm3, %v286_v42, 0.0  ;;  %v314_v56 = vsel %vm220_vm3, %v287_v43, 0.0 }
 0x118   :  { %v316_v57 = vsel %vm220_vm3, %v288_v44, 0.0  ;;  %v280_v58 = vmul.f32 %v674_v29, %v674_v29  ;;  %v296_v59 = vsel %vm220_vm3, %v278_v41, 0.0  ;;  %v318_v60 = vsel %vm220_vm3, %v289_v45, 0.0  ;;  %v329_v45 = vld [vmem:[%s833_s3] sm:$0x1] }
 0x119   :  { %v295_v54 = vadd.f32 %v294_v51, %v293_v49  ;;  %v320_v61 = vsel %vm220_vm3, %v290_v46, 0.0  ;;  %v281_v63 = vmul.f32 %v676_v30, %v676_v30  ;;  %v298_v0 = vsel %vm220_vm3, %v279_v50, 0.0 }
 0x11a   :  { %v282_v2 = vmul.f32 %v678_v31, %v678_v31  ;;  %v300_v3 = vsel %vm220_vm3, %v280_v58, 0.0  ;;  %v283_v5 = vmul.f32 %v680_v32, %v680_v32  ;;  %v334_v43 = vlaneseq  ;;  %v497_v58 = vld [vmem:[%s834_s4] ss:$0 sm:$0xff] }
 0x11b   :  { %v297_v62 = vadd.f32 %v296_v59, %v295_v54  ;;  %v302_v6 = vsel %vm220_vm3, %v281_v63, 0.0 }
 0x11c   :  { %v304_v8 = vsel %vm220_vm3, %v282_v2, 0.0  ;;  %v306_v10 = vsel %vm220_vm3, %v283_v5, 0.0  ;;  %v335_v44 = vshrl.u32 %v334_v43, 7 }
 0x11d   :  { %v299_v1 = vadd.f32 %v298_v0, %v297_v62 }
 0x11e   :  { %v336_v46 = vsub.s32 0, %v335_v44 }
 0x11f   :  { %v301_v4 = vadd.f32 %v300_v3, %v299_v1 }
 0x121   :  { %v303_v7 = vadd.f32 %v302_v6, %v301_v4 }
 0x123   :  { %v305_v9 = vadd.f32 %v304_v8, %v303_v7 }
 0x125   :  { %v307_v11 = vadd.f32 %v306_v10, %v305_v9 }
 0x127   :  { %v309_v12 = vadd.f32 %v308_v52, %v307_v11 }
 0x129   :  { %v311_v14 = vadd.f32 %v310_v53, %v309_v12 }
 0x12b   :  { %v313_v15 = vadd.f32 %v312_v55, %v311_v14 }
 0x12d   :  { %v315_v16 = vadd.f32 %v314_v56, %v313_v15 }
 0x12f   :  { %v317_v17 = vadd.f32 %v316_v57, %v315_v16 }
 0x131   :  { %v319_v19 = vadd.f32 %v318_v60, %v317_v17 }
 0x133   :  { %v321_v20 = vadd.f32 %v320_v61, %v319_v19 }
 0x135   :  { %v322_v21 = vrot.slane %v321_v20, 4 }
 0x137   :  { %v323_v36 = vadd.f32 %v322_v21, %v321_v20 }
 0x139   :  { %v324_v37 = vrot.slane %v323_v36, 2 }
 0x13b   :  { %v325_v38 = vadd.f32 %v324_v37, %v323_v36 }
 0x13d   :  { %v326_v39 = vrot.slane %v325_v38, 1 }
 0x13f   :  { %v327_v40 = vadd.f32 %v326_v39, %v325_v38 }
 0x141   :  { %v328_v41 = vmul.f32 0.0078125, %v327_v40 }
 0x143   :  { %v330_v42 = vadd.f32 1e-05, %v328_v41 }
 0x145   :  { %569 = vrsqrt.f32 %v330_v42 }
 0x14f   :  { %v570_v47 = vpop.eup %569 }
 0x150   :  { %v332_v48 = vmul.f32 %v570_v47, %v329_v45 }
 0x152   :  { %v337_v49 = vrot.slane %v332_v48, %v336_v46 }
 0x154   :  { %v339_v50 = vmul.f32 %v337_v49, %v663_v22  ;;  %v340_v51 = vmul.f32 %v337_v49, %v665_v13  ;;  %v341_v52 = vmul.f32 %v337_v49, %v668_v25  ;;  %v342_v53 = vmul.f32 %v337_v49, %v670_v27 }
 0x155   :  { %v343_v54 = vmul.f32 %v337_v49, %v672_v28  ;;  %v344_v55 = vmul.f32 %v337_v49, %v674_v29  ;;  %v345_v56 = vmul.f32 %v337_v49, %v676_v30  ;;  %v346_v57 = vmul.f32 %v337_v49, %v678_v31 }
 0x156   :  { %v347_v22 = vmul.f32 %v337_v49, %v680_v32  ;;  %v348_v13 = vmul.f32 %v337_v49, %v682_v33  ;;  %v349_v25 = vmul.f32 %v337_v49, %v684_v18  ;;  %v350_v27 = vmul.f32 %v337_v49, %v686_v24 }
 0x157   :  { %v351_v28 = vmul.f32 %v337_v49, %v688_v23  ;;  %v352_v29 = vmul.f32 %v337_v49, %v690_v26  ;;  %v353_v30 = vmul.f32 %v337_v49, %v692_v34  ;;  %v354_v31 = vmul.f32 %v337_v49, %v694_v35 }
 0x158   :  { %v362_v59 = vadd.f32 %v497_v58, %v339_v50  ;;  %v363_v60 = vadd.f32 %v497_v58, %v340_v51  ;;  %v364_v61 = vadd.f32 %v497_v58, %v341_v52  ;;  %v365_v62 = vadd.f32 %v497_v58, %v342_v53 }
 0x159   :  { %v366_v32 = vadd.f32 %v497_v58, %v343_v54  ;;  %v367_v63 = vadd.f32 %v497_v58, %v344_v55  ;;  %v368_v33 = vadd.f32 %v497_v58, %v345_v56  ;;  %v369_v0 = vadd.f32 %v497_v58, %v346_v57 }
 0x15a   :  { %v370_v18 = vadd.f32 %v497_v58, %v347_v22  ;;  %v371_v1 = vadd.f32 %v497_v58, %v348_v13  ;;  %v372_v24 = vadd.f32 %v497_v58, %v349_v25  ;;  %v373_v2 = vadd.f32 %v497_v58, %v350_v27 }
 0x15b   :  { %v374_v23 = vadd.f32 %v497_v58, %v351_v28  ;;  %v375_v3 = vadd.f32 %v497_v58, %v352_v29  ;;  %v376_v26 = vadd.f32 %v497_v58, %v353_v30  ;;  %v377_v4 = vadd.f32 %v497_v58, %v354_v31 }
 0x15c   :  { %v378_v34 = vmax.f32 %v362_v59, 0.0  ;;  %v379_v5 = vmax.f32 %v363_v60, 0.0  ;;  %v380_v35 = vmax.f32 %v364_v61, 0.0  ;;  %v381_v6 = vmax.f32 %v365_v62, 0.0 }
 0x15d   :  { %v382_v7 = vmax.f32 %v366_v32, 0.0  ;;  %v383_v8 = vmax.f32 %v367_v63, 0.0  ;;  %v384_v9 = vmax.f32 %v368_v33, 0.0  ;;  %v385_v10 = vmax.f32 %v369_v0, 0.0 }
 0x15e   :  { %v386_v11 = vmax.f32 %v370_v18, 0.0  ;;  %v387_v12 = vmax.f32 %v371_v1, 0.0  ;;  %v388_v14 = vmax.f32 %v372_v24, 0.0  ;;  %v389_v15 = vmax.f32 %v373_v2, 0.0 }
 0x15f   :  { %v390_v16 = vmax.f32 %v374_v23, 0.0  ;;  %v391_v17 = vmax.f32 %v375_v3, 0.0  ;;  %v392_v19 = vmax.f32 %v376_v26, 0.0  ;;  %v393_v20 = vmax.f32 %v377_v4, 0.0 }
 0x160   :  { %v514_v21 = vpack.c.bf16 %v378_v34, %v378_v34  ;;  %v515_v36 = vpack.c.bf16 %v379_v5, %v379_v5  ;;  %v516_v37 = vpack.c.bf16 %v380_v35, %v380_v35  ;;  %v517_v38 = vpack.c.bf16 %v381_v6, %v381_v6 }
 0x161   :  { %v518_v39 = vpack.c.bf16 %v382_v7, %v382_v7  ;;  %v519_v40 = vpack.c.bf16 %v383_v8, %v383_v8  ;;  %v520_v41 = vpack.c.bf16 %v384_v9, %v384_v9  ;;  %v521_v42 = vpack.c.bf16 %v385_v10, %v385_v10 }
 0x162   :  { %v522_v43 = vpack.c.bf16 %v386_v11, %v386_v11  ;;  %v523_v44 = vpack.c.bf16 %v387_v12, %v387_v12  ;;  %v524_v45 = vpack.c.bf16 %v388_v14, %v388_v14  ;;  %v525_v46 = vpack.c.bf16 %v389_v15, %v389_v15  ;;  %459 = vst.msk [vmem:[%s835_s5] sm:$0xf] %vm458_vm4, %v514_v21 }
 0x163   :  { %460 = vst.msk [vmem:[%s835_s5 + $0x4] sm:$0xf] %vm458_vm4, %v515_v36  ;;  %461 = vst.msk [vmem:[%s835_s5 + $0x8] sm:$0xf] %vm458_vm4, %v516_v37  ;;  %v526_v47 = vpack.c.bf16 %v390_v16, %v390_v16  ;;  %v527_v48 = vpack.c.bf16 %v391_v17, %v391_v17  ;;  %v528_v49 = vpack.c.bf16 %v392_v19, %v392_v19 }
 0x164   :  { %462 = vst.msk [vmem:[%s835_s5 + $0xc] sm:$0xf] %vm458_vm4, %v517_v38  ;;  %v529_v50 = vpack.c.bf16 %v393_v20, %v393_v20  ;;  %463 = vst.msk [vmem:[%s835_s5 + $0x10] sm:$0xf] %vm458_vm4, %v518_v39 }
 0x165   :  { %464 = vst.msk [vmem:[%s835_s5 + $0x14] sm:$0xf] %vm458_vm4, %v519_v40  ;;  %465 = vst.msk [vmem:[%s835_s5 + $0x18] sm:$0xf] %vm458_vm4, %v520_v41 }
 0x166   :  { %466 = vst.msk [vmem:[%s835_s5 + $0x1c] sm:$0xf] %vm458_vm4, %v521_v42  ;;  %467 = vst.msk [vmem:[%s835_s5 + $0x20] sm:$0xf] %vm458_vm4, %v522_v43 }
 0x167   :  { %468 = vst.msk [vmem:[%s835_s5 + $0x24] sm:$0xf] %vm458_vm4, %v523_v44  ;;  %469 = vst.msk [vmem:[%s835_s5 + $0x28] sm:$0xf] %vm458_vm4, %v524_v45 }
 0x168   :  { %470 = vst.msk [vmem:[%s835_s5 + $0x2c] sm:$0xf] %vm458_vm4, %v525_v46  ;;  %471 = vst.msk [vmem:[%s835_s5 + $0x30] sm:$0xf] %vm458_vm4, %v526_v47 }
 0x169   :  { %472 = vst.msk [vmem:[%s835_s5 + $0x34] sm:$0xf] %vm458_vm4, %v527_v48  ;;  %473 = vst.msk [vmem:[%s835_s5 + $0x38] sm:$0xf] %vm458_vm4, %v528_v49 }
 0x16a   :  { %474 = vst.msk [vmem:[%s835_s5 + $0x3c] sm:$0xf] %vm458_vm4, %v529_v50 }

// kernel: cae_forward.6
= control target key start
LH: loop header
LB: loop body
LE: loop exit
PB: predicated region body
PF: predicated region fallthrough
CT: control target
= control target key end

     0   :  { %vm62_vm0 = vcmask 293888   ;;  %vm69_vm1 = vcmask 1041408   ;;  %vm122_vm2 = vcmask 64512   ;;  %v164_v52 = vlaneseq  ;;  %s327_s1 = inlined_call_operand.vmem [shape: bf16[36,8], index: 1, kind: input, shape index: {}]   ;;  %s328_s0 = inlined_call_operand.vmem [shape: bf16[32,36], index: 0, kind: input, shape index: {}]   ;;  %s329_s2 = inlined_call_operand.vmem [shape: f32[1,8], index: 2, kind: input, shape index: {}]   ;;  %s330_s3 = inlined_call_operand.vmem [shape: f32[1,8], index: 3, kind: input, shape index: {}]   ;;  %s331_s4 = inlined_call_operand.vmem [shape: f32[1,8], index: 4, kind: input, shape index: {}]   ;;  %s332_s5 = inlined_call_operand.vmem [shape: bf16[32,8], index: 5, kind: output, shape index: {}]  }
   0x1   :  { %v246_v0 = vld [vmem:[%s327_s1] sm:$0xff]   ;;  %v247_v1 = vld [vmem:[%s327_s1 + $0x8] sm:$0xff]   ;;  %v248_v3 = vld [vmem:[%s327_s1 + $0x10] ss:$0 sps:$4 sm:$0x33]   ;;  %vm204_vm3 = vcmask 60416  }
   0x2   :  { %235 = vmatprep.subr.bf16.mxu0 %v246_v0  ;;  %v249_v2 = vld [vmem:[%s328_s0] sm:$0xff]   ;;  %v71_v4 = vsel %vm69_vm1, %v248_v3, 0  ;;  %v250_v5 = vld [vmem:[%s328_s0 + $0x8] sm:$0xff]   ;;  %v165_v53 = vshrl.u32 %v164_v52, 7 }
   0x3   :  { %236 = vmatpush3.bf16.msra.mxu0 %v246_v0  ;;  %241 = vmatprep.mubr.msk.bf16.mxu0 %vm62_vm0, %v249_v2  ;;  %v213_v6 = vld [vmem:[%s329_s2] ss:$0 sm:$0xff] }
   0x4   :  { %237 = vmatprep.subr.bf16.mxu0 %v247_v1  ;;  %v159_v54 = vld [vmem:[%s330_s3] sm:$0x1]  ;;  %v166_v55 = vsub.s32 0, %v165_v53 }
   0x5   :  { %v221_v59 = vld [vmem:[%s331_s4] ss:$0 sm:$0xff] }
   0x7   :  { %238 = vmatpush3.bf16.msra.mxu0 %v247_v1 }
   0x8   :  { %245 = vmatprep.subr.msk.bf16.mxu0 %vm69_vm1, %v248_v3 }
   0xb   :  { %240 = vmatpush3.bf16.msra.mxu0 %v71_v4 }
   0xe   :  { %242 = vmatmul.mubr.msk.bf16.vlgmr.msra.gmra.mrb[0].mxu0 %vm62_vm0, %v250_v5 }
  0xe1   :  { %v243_v7 = vpop.f32.mrb[0].mxu0 }
  0xe2   :  { %v107_v8 = vpop.f32.mrb[1].mxu0  ;;  %v116_v12 = vadd.f32 %v243_v7, %v213_v6 }
  0xe3   :  { %v108_v9 = vadd.f32 %v213_v6, %v107_v8  ;;  %v244_v10 = vpop.f32.mrb[2].mxu0 }
  0xe4   :  { %v110_v11 = vpop.f32.mrb[3].mxu0  ;;  %v119_v15 = vadd.f32 %v244_v10, %v213_v6  ;;  %v126_v18 = vsel %vm122_vm2, %v116_v12, 0.0 }
  0xe5   :  { %v111_v13 = vadd.f32 %v213_v6, %v110_v11  ;;  %v123_v14 = vsel %vm122_vm2, %v108_v9, 0.0 }
  0xe6   :  { %v128_v20 = vsel %vm122_vm2, %v119_v15, 0.0 }
  0xe7   :  { %v124_v16 = vsel %vm122_vm2, %v111_v13, 0.0 }
  0xe8   :  { %v125_v17 = vadd.f32 %v124_v16, %v123_v14 }
  0xea   :  { %v127_v19 = vadd.f32 %v126_v18, %v125_v17 }
  0xec   :  { %v129_v21 = vadd.f32 %v128_v20, %v127_v19 }
  0xee   :  { %v130_v22 = vrot.slane %v129_v21, 4 }
  0xf0   :  { %v131_v23 = vadd.f32 %v130_v22, %v129_v21 }
  0xf2   :  { %v132_v24 = vrot.slane %v131_v23, 2 }
  0xf4   :  { %v133_v25 = vadd.f32 %v132_v24, %v131_v23 }
  0xf6   :  { %v134_v26 = vrot.slane %v133_v25, 1 }
  0xf8   :  { %v135_v27 = vadd.f32 %v134_v26, %v133_v25 }
  0xfa   :  { %v136_v28 = vmul.f32 0.03125, %v135_v27 }
  0xfc   :  { %v137_v29 = vsub.f32 %v108_v9, %v136_v28  ;;  %v138_v30 = vsub.f32 %v111_v13, %v136_v28  ;;  %v139_v31 = vsub.f32 %v116_v12, %v136_v28  ;;  %v140_v32 = vsub.f32 %v119_v15, %v136_v28 }
  0xfe   :  { %v141_v33 = vmul.f32 %v137_v29, %v137_v29  ;;  %v142_v34 = vmul.f32 %v138_v30, %v138_v30  ;;  %v143_v35 = vmul.f32 %v139_v31, %v139_v31  ;;  %v144_v36 = vmul.f32 %v140_v32, %v140_v32 }
 0x100   :  { %v145_v37 = vsel %vm122_vm2, %v141_v33, 0.0  ;;  %v146_v38 = vsel %vm122_vm2, %v142_v34, 0.0  ;;  %v148_v40 = vsel %vm122_vm2, %v143_v35, 0.0  ;;  %v150_v42 = vsel %vm122_vm2, %v144_v36, 0.0 }
 0x101   :  { %v147_v39 = vadd.f32 %v146_v38, %v145_v37 }
 0x103   :  { %v149_v41 = vadd.f32 %v148_v40, %v147_v39 }
 0x105   :  { %v151_v43 = vadd.f32 %v150_v42, %v149_v41 }
 0x107   :  { %v152_v44 = vrot.slane %v151_v43, 4 }
 0x109   :  { %v153_v45 = vadd.f32 %v152_v44, %v151_v43 }
 0x10b   :  { %v154_v46 = vrot.slane %v153_v45, 2 }
 0x10d   :  { %v155_v47 = vadd.f32 %v154_v46, %v153_v45 }
 0x10f   :  { %v156_v48 = vrot.slane %v155_v47, 1 }
 0x111   :  { %v157_v49 = vadd.f32 %v156_v48, %v155_v47 }
 0x113   :  { %v158_v50 = vmul.f32 0.03125, %v157_v49 }
 0x115   :  { %v160_v51 = vadd.f32 1e-05, %v158_v50 }
 0x117   :  { %251 = vrsqrt.f32 %v160_v51 }
 0x121   :  { %v252_v56 = vpop.eup %251 }
 0x122   :  { %v162_v57 = vmul.f32 %v252_v56, %v159_v54 }
 0x124   :  { %v167_v58 = vrot.slane %v162_v57, %v166_v55 }
 0x126   :  { %v169_v60 = vmul.f32 %v167_v58, %v137_v29  ;;  %v170_v61 = vmul.f32 %v167_v58, %v138_v30  ;;  %v171_v62 = vmul.f32 %v167_v58, %v139_v31  ;;  %v172_v63 = vmul.f32 %v167_v58, %v140_v32 }
 0x128   :  { %v180_v0 = vadd.f32 %v221_v59, %v169_v60  ;;  %v181_v1 = vadd.f32 %v221_v59, %v170_v61  ;;  %v182_v2 = vadd.f32 %v221_v59, %v171_v62  ;;  %v183_v3 = vadd.f32 %v221_v59, %v172_v63 }
 0x12a   :  { %v184_v4 = vmax.f32 %v180_v0, 0.0  ;;  %v185_v5 = vmax.f32 %v181_v1, 0.0  ;;  %v186_v6 = vmax.f32 %v182_v2, 0.0  ;;  %v187_v7 = vmax.f32 %v183_v3, 0.0 }
 0x12c   :  { %v226_v8 = vpack.c.bf16 %v184_v4, %v184_v4  ;;  %v227_v9 = vpack.c.bf16 %v185_v5, %v185_v5  ;;  %v228_v10 = vpack.c.bf16 %v186_v6, %v186_v6  ;;  %v229_v11 = vpack.c.bf16 %v187_v7, %v187_v7 }
 0x12e   :  { %205 = vst.msk [vmem:[%s332_s5] sm:$0xf] %vm204_vm3, %v226_v8  ;;  %206 = vst.msk [vmem:[%s332_s5 + $0x4] sm:$0xf] %vm204_vm3, %v227_v9 }
 0x12f   :  { %207 = vst.msk [vmem:[%s332_s5 + $0x8] sm:$0xf] %vm204_vm3, %v228_v10  ;;  %208 = vst.msk [vmem:[%s332_s5 + $0xc] sm:$0xf] %vm204_vm3, %v229_v11 }

// kernel: cae_forward.7
= control target key start
LH: loop header
LB: loop body
LE: loop exit
PB: predicated region body
PF: predicated region fallthrough
CT: control target
= control target key end

     0   :  { %v487_v1 = vmov 0.0   ;;  %vm488_vm0 = vmmov 0   ;;  %s637_s0 = inlined_call_operand.vmem [shape: bf16[2,128], index: 0, kind: input, shape index: {}]   ;;  %s638_s1 = inlined_call_operand.vmem [shape: bf16[128,32], index: 1, kind: input, shape index: {}]   ;;  %s639_s2 = inlined_call_operand.vmem [shape: f32[1,32], index: 2, kind: input, shape index: {}]   ;;  %s640_s3 = inlined_call_operand.vmem [shape: bf16[32,16], index: 3, kind: input, shape index: {}]   ;;  %s641_s4 = inlined_call_operand.vmem [shape: f32[1,16], index: 4, kind: input, shape index: {}]   ;;  %s642_s5 = inlined_call_operand.vmem [shape: bf16[16,32], index: 5, kind: input, shape index: {}]   ;;  %s643_s6 = inlined_call_operand.vmem [shape: f32[1,32], index: 6, kind: input, shape index: {}]   ;;  %s644_s7 = inlined_call_operand.vmem [shape: bf16[32,128], index: 7, kind: input, shape index: {}]   ;;  %s645_s8 = inlined_call_operand.vmem [shape: f32[1,128], index: 8, kind: input, shape index: {}]   ;;  %s646_s9 = inlined_call_operand.hbm [shape: f32[2,16], index: 9, kind: output, shape index: {0}]   ;;  %s647_s10 = inlined_call_operand.vmem [shape: bf16[2,128], index: 10, kind: output, shape index: {1}]  }
   0x1   :  { %v450_v0 = vld [vmem:[%s638_s1] sm:$0xff]   ;;  %405 = vmatprep.subr.bf16.mxu0 %v487_v1  ;;  %425 = vmatprep.subr.bf16.mxu1 %v487_v1  ;;  %v451_v2 = vld [vmem:[%s638_s1 + $0x8] sm:$0xff]   ;;  %v452_v3 = vld [vmem:[%s638_s1 + $0x10] sm:$0xff]  }
   0x2   :  { %406 = vmatpush3.bf16.msra.mxu0 %v450_v0  ;;  %421 = vmatprep.mubr.msk.bf16.mxu0 %vm488_vm0, %v487_v1  ;;  %v453_v4 = vld [vmem:[%s638_s1 + $0x18] sm:$0xff]  }
   0x3   :  { %407 = vmatprep.subr.bf16.mxu0 %v487_v1  ;;  %429 = vmatprep.mubr.msk.bf16.mxu1 %vm488_vm0, %v487_v1 }
   0x6   :  { %408 = vmatpush3.bf16.msra.mxu0 %v451_v2 }
   0x7   :  { %409 = vmatprep.subr.bf16.mxu0 %v487_v1 }
   0xa   :  { %410 = vmatpush3.bf16.msra.mxu0 %v452_v3 }
   0xb   :  { %411 = vmatprep.subr.bf16.mxu0 %v487_v1 }
   0xc   :  { %16 = vsyncpa [#allocation3], 0  ;;  %v454_v5 = vld [vmem:[%s638_s1 + $0x20] sm:$0xff]   ;;  %v455_v6 = vld [vmem:[%s638_s1 + $0x28] sm:$0xff]   ;;  %vm173_vm1 = vcmask 261120   ;;  %vm217_vm2 = vcmask 123904  }
   0xd   :  { %v456_v7 = vld [vmem:[%s638_s1 + $0x30] sm:$0xff]   ;;  %v457_v8 = vld [vmem:[%s638_s1 + $0x38] sm:$0xff]   ;;  %v36_v9 = vld [vmem:[%s637_s0] sm:$0x1]  ;;  %vm235_vm3 = vcmask 130048   ;;  %s489_s21 = smov [#allocation2]  }
   0xe   :  { %412 = vmatpush3.bf16.msra.mxu0 %v453_v4  ;;  %v458_v10 = vld [vmem:[%s640_s3] sm:$0xff]   ;;  %v459_v11 = vld [vmem:[%s640_s3 + $0x8] sm:$0xff]   ;;  %s356_s22 = sshll.u32 %s489_s21, 4  ;;  %s357_s22 = int_to_ptr.vmem [resolvable:$true] %s356_s22 }
   0xf   :  { %413 = vmatprep.subr.bf16.mxu0 %v487_v1  ;;  %426 = vmatpush3.bf16.msra.mxu1 %v458_v10  ;;  %v368_v12 = vld [vmem:[%s639_s2] ss:$0 sm:$0xff]  ;;  %v462_v29 = vld [vmem:[%s644_s7 + $0x8] sm:$0xff]   ;;  %s463_s23 = scalar_lea.vmem %s357_s22, 32  ;;  %p468_p1 = scmp.lt.s32.totalorder %s357_s22, %s357_s22 }
  0x10   :  { %427 = vmatprep.subr.bf16.mxu1 %v487_v1  ;;  %v460_v19 = vld [vmem:[%s642_s5] sm:$0xff]   ;;  %p464_p0 = scmp.ne.s32.totalorder %s357_s22, %s463_s23  ;;  %p469_p2 = scmp.lt.s32.totalorder %s463_s23, %s463_s23 }
  0x11   :  { %v377_v21 = vld [vmem:[%s641_s4] ss:$0 sm:$0xff] }
  0x12   :  { %414 = vmatpush3.bf16.msra.mxu0 %v454_v5  ;;  %v461_v26 = vld [vmem:[%s644_s7] sm:$0xff]   ;;  %p470_p3 = por %p469_p2, %p468_p1 }
  0x13   :  { %415 = vmatprep.subr.bf16.mxu0 %v487_v1  ;;  %428 = vmatpush3.bf16.msra.mxu1 %v459_v11  ;;  %v381_v30 = vld [vmem:[%s643_s6] ss:$0 sm:$0xff] }
  0x14   :  { %433 = vmatprep.subr.bf16.mxu1 %v487_v1  ;;  %p471_p4 = pnand %p470_p3, %p464_p0 }
  0x16   :  { %416 = vmatpush3.bf16.msra.mxu0 %v455_v6 }
  0x17   :  { %417 = vmatprep.subr.bf16.mxu0 %v487_v1 }
  0x1a   :  { %418 = vmatpush3.bf16.msra.mxu0 %v456_v7 }
  0x1b   :  { %419 = vmatprep.subr.bf16.mxu0 %v487_v1 }
  0x1e   :  { %420 = vmatpush3.bf16.msra.mxu0 %v457_v8 }
  0x21   :  { %422 = vmatmul.mubr.bf16.vlgmr.msra.gmra.mrb[0].mxu0 %v36_v9 }
  0xf4   :  { %v142_v13 = vpop.f32.mrb[0].mxu0 }
  0xf5   :  { %v143_v14 = vadd.f32 %v368_v12, %v142_v13  ;;  %v423_v15 = vpop.f32.mrb[1].mxu0 }
  0xf6   :  { %v145_v16 = vpop.f32.mrb[2].mxu0 }
  0xf7   :  { %v148_v17 = vmax.f32 %v143_v14, 0.0  ;;  %v424_v18 = vpop.f32.mrb[3].mxu0 }
  0xf9   :  { %v149_v20 = vpack.c.bf16 %v148_v17, %v148_v17 }
  0xfb   :  { %430 = vmatmul.mubr.msk.bf16.vlgmr.msra.gmra.mrb[0].mxu1 %vm173_vm1, %v149_v20 }
  0xfc   :  { %434 = vmatpush3.bf16.msra.mxu1 %v460_v19  ;;  %435 = vmatprep.mubr.msk.bf16.mxu1 %vm488_vm0, %v487_v1 }
  0xfd   :  { %439 = vmatprep.subr.bf16.mxu1 %v487_v1 }
 0x1ce   :  { %v211_v22 = vpop.f32.mrb[0].mxu1 }
 0x1cf   :  { %v212_v23 = vadd.f32 %v377_v21, %v211_v22  ;;  %v431_v24 = vpop.f32.mrb[1].mxu1 }
 0x1d0   :  { %v214_v25 = vpop.f32.mrb[2].mxu1 }
 0x1d1   :  { %v219_v27 = vpack.c.bf16 %v212_v23, %v212_v23  ;;  %v432_v28 = vpop.f32.mrb[3].mxu1  ;;  %218 = vst.msk [vmem:[#allocation2] sm:$0x3] %vm217_vm2, %v212_v23 }
 0x1d3   :  { %436 = vmatmul.mubr.msk.bf16.vlgmr.msra.gmra.mrb[4].mxu1 %vm235_vm3, %v219_v27 }
 0x1d4   :  { %440 = vmatpush3.bf16.msra.mxu1 %v461_v26  ;;  %443 = vmatprep.mubr.msk.bf16.mxu1 %vm488_vm0, %v487_v1 }
 0x1d5   :  { %441 = vmatprep.subr.bf16.mxu1 %v487_v1 }
 0x1d8   :  { %442 = vmatpush3.bf16.msra.mxu1 %v462_v29 }
 0x2a6   :  { %v273_v31 = vpop.f32.mrb[4].mxu1 }
 0x2a7   :  { %v274_v32 = vadd.f32 %v381_v30, %v273_v31  ;;  %v437_v33 = vpop.f32.mrb[5].mxu1 }
 0x2a8   :  { %v276_v34 = vpop.f32.mrb[6].mxu1 }
 0x2a9   :  { %v279_v35 = vmax.f32 %v274_v32, 0.0  ;;  %v438_v36 = vpop.f32.mrb[7].mxu1 }
 0x2ab   :  { %v280_v37 = vpack.c.bf16 %v279_v35, %v279_v35 }
 0x2ad   :  { %444 = vmatmul.mubr.msk.bf16.vlgmr.msra.gmra.mrb[8].mxu1 %vm173_vm1, %v280_v37 }
 0x2ae   :  { %474 = shalt.err (!%p471_p4)
}
 0x2af   :  { %s475_s24 = scalar_lea.hbm %s646_s9, 32 }
 0x2b0   :  { %p476_p5 = scmp.ne.s32.totalorder %s646_s9, %s475_s24  ;;  %p479_p6 = scmp.lt.u32.totalorder %s475_s24, %s646_s9 }
 0x2b2   :  { %p481_p7 = pnand %p479_p6, %p476_p5 }
 0x2b4   :  { %484 = shalt.err (!%p481_p7)
}
 0x2b5   :  { %359 = dma.vmem_to_hbm [thread:$0]  %s357_s22, 32, %s646_s9, [#allocation3]   ;;  %v384_v38 = vld [vmem:[%s645_s8] ss:$0 sm:$0xff] }
 0x380   :  { %v341_v39 = vpop.f32.mrb[8].mxu1 }
 0x381   :  { %v342_v40 = vadd.f32 %v384_v38, %v341_v39  ;;  %v445_v41 = vpop.f32.mrb[9].mxu1 }
 0x382   :  { %v344_v42 = vpop.f32.mrb[10].mxu1 }
 0x383   :  { %v347_v43 = vmax.f32 %v342_v40, 0.0  ;;  %v446_v44 = vpop.f32.mrb[11].mxu1 }
 0x385   :  { %v348_v45 = vpack.c.bf16 %v347_v43, %v347_v43 }
 0x387   :  { %349 = vst [vmem:[%s647_s10] sm:$0x1] %v348_v45 }
 0x388   :  { %485 = dma.done.wait [#allocation3], 32  }
 0x389   :  { %486 = vsyncadd [#allocation3], 4294967264 }
 0x38a   :  { %367 = vsyncpa [#allocation3], 1 }

// kernel: cae_forward.8
= control target key start
LH: loop header
LB: loop body
LE: loop exit
PB: predicated region body
PF: predicated region fallthrough
CT: control target
= control target key end

     0   :  { %vm61_vm0 = vcmask 261120   ;;  %vm119_vm1 = vcmask 130048   ;;  %v355_v61 = vlaneseq  ;;  %vm395_vm2 = vcmask 125952   ;;  %s576_s1 = inlined_call_operand.vmem [shape: bf16[32,16], index: 1, kind: input, shape index: {}]   ;;  %s577_s0 = inlined_call_operand.vmem [shape: bf16[32,32], index: 0, kind: input, shape index: {}]   ;;  %s578_s5 = inlined_call_operand.vmem [shape: f32[16,16], index: 5, kind: input, shape index: {}]   ;;  %s579_s2 = inlined_call_operand.vmem [shape: f32[1,16], index: 2, kind: input, shape index: {}]   ;;  %s580_s3 = inlined_call_operand.vmem [shape: f32[1,16], index: 3, kind: input, shape index: {}]   ;;  %s581_s4 = inlined_call_operand.vmem [shape: f32[1,16], index: 4, kind: input, shape index: {}]   ;;  %s582_s6 = inlined_call_operand.vmem [shape: bf16[32,16], index: 6, kind: output, shape index: {}]  }
   0x1   :  { %v480_v0 = vld [vmem:[%s576_s1] sm:$0xff]   ;;  %v481_v1 = vld [vmem:[%s576_s1 + $0x8] sm:$0xff]  }
   0x2   :  { %444 = vmatprep.subr.bf16.mxu0 %v480_v0  ;;  %v482_v2 = vld [vmem:[%s577_s0] sm:$0xff]   ;;  %v483_v3 = vld [vmem:[%s577_s0 + $0x8] sm:$0xff]   ;;  %v356_v62 = vshrl.u32 %v355_v61, 7 }
   0x3   :  { %445 = vmatpush3.bf16.msra.mxu0 %v480_v0  ;;  %448 = vmatprep.mubr.msk.bf16.mxu0 %vm61_vm0, %v482_v2  ;;  %v117_v4 = vld [vmem:[%s578_s5] sm:$0xff]  ;;  %v118_v5 = vld [vmem:[%s578_s5 + $0x8] sm:$0xff] }
   0x4   :  { %446 = vmatprep.subr.bf16.mxu0 %v481_v1  ;;  %v472_v6 = vpack.c.bf16 %v118_v5, %v117_v4  ;;  %v404_v7 = vld [vmem:[%s579_s2] ss:$0 sm:$0xff]  ;;  %v357_v0 = vsub.s32 0, %v356_v62 }
   0x5   :  { %v350_v63 = vld [vmem:[%s580_s3] sm:$0x1] }
   0x6   :  { %473 = vmatprep.subr.bf16.mxu1 %v472_v6  ;;  %v419_v4 = vld [vmem:[%s581_s4] ss:$0 sm:$0xff] }
   0x7   :  { %447 = vmatpush3.bf16.msra.mxu0 %v481_v1  ;;  %475 = vmatpush3.bf16.msra.mxu1 %v472_v6 }
   0x8   :  { %477 = vmatprep.subr.bf16.mxu1 %v472_v6 }
   0xa   :  { %449 = vmatmul.mubr.msk.bf16.vlgmr.msra.gmra.mrb[0].mxu0 %vm61_vm0, %v483_v3 }
  0xdd   :  { %v450_v8 = vpop.f32.mrb[0].mxu0 }
  0xde   :  { %v102_v9 = vpop.f32.mrb[1].mxu0  ;;  %v111_v14 = vadd.f32 %v450_v8, %v404_v7 }
  0xdf   :  { %v103_v10 = vadd.f32 %v404_v7, %v102_v9  ;;  %v451_v11 = vpop.f32.mrb[2].mxu0 }
  0xe0   :  { %v105_v12 = vpop.f32.mrb[3].mxu0  ;;  %v114_v15 = vadd.f32 %v451_v11, %v404_v7 }
  0xe1   :  { %v106_v13 = vadd.f32 %v404_v7, %v105_v12  ;;  %456 = vmatprep.mubr.msk.f32.mxu1 %vm119_vm1, %v103_v10 }
  0xe3   :  { %457 = vmatmul.mubr.msk.f32.vlgmr.msra.gmra.mrb[0].mxu1 %vm119_vm1, %v106_v13 }
  0xe4   :  { %459 = vmatprep.mubr.msk.f32.mxu1 %vm119_vm1, %v111_v14  ;;  %479 = vmatpush3.bf16.msra.mxu1 %v472_v6 }
  0xe7   :  { %460 = vmatmul.mubr.msk.f32.gmra.mrb[2].mxu1 %vm119_vm1, %v114_v15 }
 0x1b6   :  { %v458_v16 = vpop.f32.mrb[0].mxu1 }
 0x1b7   :  { %v218_v17 = vsel %vm119_vm1, %v458_v16, 0.0  ;;  %v198_v18 = vpop.f32.mrb[1].mxu1 }
 0x1b8   :  { %v217_v19 = vsel %vm119_vm1, %v198_v18, 0.0 }
 0x1b9   :  { %v219_v20 = vadd.f32 %v218_v17, %v217_v19 }
 0x1ba   :  { %v461_v21 = vpop.f32.mrb[2].mxu1 }
 0x1bb   :  { %v208_v22 = vpop.f32.mrb[3].mxu1  ;;  %v222_v25 = vsel %vm119_vm1, %v461_v21, 0.0 }
 0x1bc   :  { %v220_v23 = vsel %vm119_vm1, %v208_v22, 0.0 }
 0x1bd   :  { %v221_v24 = vadd.f32 %v220_v23, %v219_v20 }
 0x1bf   :  { %v223_v26 = vadd.f32 %v222_v25, %v221_v24 }
 0x1c1   :  { %v224_v27 = vrot.slane %v223_v26, 4 }
 0x1c3   :  { %v225_v28 = vadd.f32 %v224_v27, %v223_v26 }
 0x1c5   :  { %v226_v29 = vrot.slane %v225_v28, 2 }
 0x1c7   :  { %v227_v30 = vadd.f32 %v226_v29, %v225_v28 }
 0x1c9   :  { %v228_v31 = vrot.slane %v227_v30, 1 }
 0x1cb   :  { %v229_v32 = vadd.f32 %v228_v31, %v227_v30 }
 0x1cd   :  { %v230_v33 = vmul.f32 0.0078125, %v229_v32 }
 0x1cf   :  { %v232_v34 = vsub.f32 %v106_v13, %v230_v33  ;;  %v231_v35 = vsub.f32 %v103_v10, %v230_v33  ;;  %v233_v36 = vsub.f32 %v111_v14, %v230_v33  ;;  %v234_v39 = vsub.f32 %v114_v15, %v230_v33 }
 0x1d1   :  { %v235_v37 = vmul.f32 %v231_v35, %v231_v35  ;;  %v236_v38 = vmul.f32 %v232_v34, %v232_v34  ;;  %v237_v40 = vmul.f32 %v233_v36, %v233_v36  ;;  %v238_v41 = vmul.f32 %v234_v39, %v234_v39 }
 0x1d3   :  { %466 = vmatprep.mubr.msk.f32.mxu1 %vm119_vm1, %v235_v37 }
 0x1d4   :  { %467 = vmatmul.mubr.msk.f32.vlgmr.msra.gmra.mrb[4].mxu1 %vm119_vm1, %v236_v38 }
 0x1d5   :  { %469 = vmatprep.mubr.msk.f32.mxu1 %vm119_vm1, %v237_v40 }
 0x1d8   :  { %470 = vmatmul.mubr.msk.f32.gmra.mrb[6].mxu1 %vm119_vm1, %v238_v41 }
 0x2a7   :  { %v468_v42 = vpop.f32.mrb[4].mxu1 }
 0x2a8   :  { %v337_v43 = vsel %vm119_vm1, %v468_v42, 0.0  ;;  %v317_v44 = vpop.f32.mrb[5].mxu1 }
 0x2a9   :  { %v336_v45 = vsel %vm119_vm1, %v317_v44, 0.0 }
 0x2aa   :  { %v338_v46 = vadd.f32 %v337_v43, %v336_v45 }
 0x2ab   :  { %v471_v47 = vpop.f32.mrb[6].mxu1 }
 0x2ac   :  { %v327_v48 = vpop.f32.mrb[7].mxu1  ;;  %v341_v51 = vsel %vm119_vm1, %v471_v47, 0.0 }
 0x2ad   :  { %v339_v49 = vsel %vm119_vm1, %v327_v48, 0.0 }
 0x2ae   :  { %v340_v50 = vadd.f32 %v339_v49, %v338_v46 }
 0x2b0   :  { %v342_v52 = vadd.f32 %v341_v51, %v340_v50 }
 0x2b2   :  { %v343_v53 = vrot.slane %v342_v52, 4 }
 0x2b4   :  { %v344_v54 = vadd.f32 %v343_v53, %v342_v52 }
 0x2b6   :  { %v345_v55 = vrot.slane %v344_v54, 2 }
 0x2b8   :  { %v346_v56 = vadd.f32 %v345_v55, %v344_v54 }
 0x2ba   :  { %v347_v57 = vrot.slane %v346_v56, 1 }
 0x2bc   :  { %v348_v58 = vadd.f32 %v347_v57, %v346_v56 }
 0x2be   :  { %v349_v59 = vmul.f32 0.0078125, %v348_v58 }
 0x2c0   :  { %v351_v60 = vadd.f32 1e-05, %v349_v59 }
 0x2c2   :  { %484 = vrsqrt.f32 %v351_v60 }
 0x2cc   :  { %v485_v1 = vpop.eup %484 }
 0x2cd   :  { %v353_v2 = vmul.f32 %v485_v1, %v350_v63 }
 0x2cf   :  { %v358_v3 = vrot.slane %v353_v2, %v357_v0 }
 0x2d1   :  { %v360_v5 = vmul.f32 %v358_v3, %v231_v35  ;;  %v361_v6 = vmul.f32 %v358_v3, %v232_v34  ;;  %v362_v7 = vmul.f32 %v358_v3, %v233_v36  ;;  %v363_v8 = vmul.f32 %v358_v3, %v234_v39 }
 0x2d3   :  { %v371_v9 = vadd.f32 %v419_v4, %v360_v5  ;;  %v372_v10 = vadd.f32 %v419_v4, %v361_v6  ;;  %v373_v11 = vadd.f32 %v419_v4, %v362_v7  ;;  %v374_v12 = vadd.f32 %v419_v4, %v363_v8 }
 0x2d5   :  { %v375_v13 = vmax.f32 %v371_v9, 0.0  ;;  %v376_v14 = vmax.f32 %v372_v10, 0.0  ;;  %v377_v15 = vmax.f32 %v373_v11, 0.0  ;;  %v378_v16 = vmax.f32 %v374_v12, 0.0 }
 0x2d7   :  { %v424_v17 = vpack.c.bf16 %v375_v13, %v375_v13  ;;  %v425_v18 = vpack.c.bf16 %v376_v14, %v376_v14  ;;  %v426_v19 = vpack.c.bf16 %v377_v15, %v377_v15  ;;  %v427_v20 = vpack.c.bf16 %v378_v16, %v378_v16 }
 0x2d9   :  { %396 = vst.msk [vmem:[%s582_s6] sm:$0xf] %vm395_vm2, %v424_v17  ;;  %397 = vst.msk [vmem:[%s582_s6 + $0x4] sm:$0xf] %vm395_vm2, %v425_v18 }
 0x2da   :  { %398 = vst.msk [vmem:[%s582_s6 + $0x8] sm:$0xf] %vm395_vm2, %v426_v19  ;;  %399 = vst.msk [vmem:[%s582_s6 + $0xc] sm:$0xf] %vm395_vm2, %v427_v20 }

// kernel: cae_forward.9
= control target key start
LH: loop header
LB: loop body
LE: loop exit
PB: predicated region body
PF: predicated region fallthrough
CT: control target
= control target key end

     0   :  { %vm86_vm0 = vcmask 130048   ;;  %vm304_vm1 = vcmask 31744   ;;  %s601_s1 = inlined_call_operand.vmem [shape: bf16[16,4], index: 1, kind: input, shape index: {}]   ;;  %s602_s0 = inlined_call_operand.vmem [shape: bf16[128,16], index: 0, kind: input, shape index: {}]   ;;  %s603_s2 = inlined_call_operand.vmem [shape: f32[1,4], index: 2, kind: input, shape index: {}]   ;;  %s604_s3 = inlined_call_operand.vmem [shape: f32[128,4], index: 3, kind: output, shape index: {}]  }
   0x1   :  { %v388_v0 = vld [vmem:[%s601_s1] sm:$0xff]   ;;  %v391_v3 = vld [vmem:[%s602_s0 + $0x8] sm:$0xff]   ;;  %v393_v5 = vld [vmem:[%s602_s0 + $0x10] sm:$0xff]  }
   0x2   :  { %v389_v1 = vld [vmem:[%s602_s0] sm:$0xff]   ;;  %368 = vmatprep.subr.bf16.mxu0 %v388_v0  ;;  %386 = vmatprep.subr.bf16.mxu1 %v388_v0  ;;  %v392_v4 = vld [vmem:[%s602_s0 + $0x28] sm:$0xff]   ;;  %v394_v6 = vld [vmem:[%s602_s0 + $0x30] sm:$0xff]  }
   0x3   :  { %v390_v2 = vld [vmem:[%s602_s0 + $0x20] sm:$0xff]   ;;  %369 = vmatpush3.bf16.msra.mxu0 %v388_v0  ;;  %387 = vmatpush3.bf16.msra.mxu1 %v388_v0  ;;  %v395_v7 = vld [vmem:[%s602_s0 + $0x18] sm:$0xff]  }
   0x4   :  { %370 = vmatprep.mubr.msk.bf16.mxu0 %vm86_vm0, %v389_v1  ;;  %378 = vmatprep.mubr.msk.bf16.mxu1 %vm86_vm0, %v390_v2  ;;  %v396_v8 = vld [vmem:[%s602_s0 + $0x38] sm:$0xff]   ;;  %v519_v9 = vld [vmem:[%s603_s2] ss:$0 sm:$0xff] }
   0x6   :  { %371 = vmatmul.mubr.msk.bf16.vlgmr.msra.gmra.mrb[0].mxu0 %vm86_vm0, %v391_v3  ;;  %379 = vmatmul.mubr.msk.bf16.vlgmr.msra.gmra.mrb[0].mxu1 %vm86_vm0, %v392_v4 }
   0x7   :  { %374 = vmatprep.mubr.msk.bf16.mxu0 %vm86_vm0, %v393_v5  ;;  %382 = vmatprep.mubr.msk.bf16.mxu1 %vm86_vm0, %v394_v6 }
   0xe   :  { %375 = vmatmul.mubr.msk.bf16.gmra.mrb[4].mxu0 %vm86_vm0, %v395_v7  ;;  %383 = vmatmul.mubr.msk.bf16.gmra.mrb[4].mxu1 %vm86_vm0, %v396_v8 }
  0xd9   :  { %v372_v10 = vpop.f32.mrb[0].mxu0  ;;  %v380_v11 = vpop.f32.mrb[0].mxu1 }
  0xda   :  { %v154_v12 = vadd.f32 %v372_v10, %v519_v9  ;;  %v186_v13 = vadd.f32 %v380_v11, %v519_v9  ;;  %v145_v14 = vpop.f32.mrb[1].mxu0  ;;  %v177_v15 = vpop.f32.mrb[1].mxu1 }
  0xdb   :  { %v146_v16 = vadd.f32 %v519_v9, %v145_v14  ;;  %v178_v17 = vadd.f32 %v519_v9, %v177_v15  ;;  %v373_v18 = vpop.f32.mrb[2].mxu0  ;;  %v381_v19 = vpop.f32.mrb[2].mxu1 }
  0xdc   :  { %v345_v20 = vmul.f32 -1.442695, %v154_v12  ;;  %v353_v21 = vmul.f32 -1.442695, %v186_v13  ;;  %v157_v22 = vadd.f32 %v373_v18, %v519_v9  ;;  %v189_v23 = vadd.f32 %v381_v19, %v519_v9  ;;  %v148_v24 = vpop.f32.mrb[3].mxu0  ;;  %v180_v25 = vpop.f32.mrb[3].mxu1 }
  0xdd   :  { %v343_v26 = vmul.f32 -1.442695, %v146_v16  ;;  %v351_v27 = vmul.f32 -1.442695, %v178_v17  ;;  %v149_v28 = vadd.f32 %v519_v9, %v148_v24  ;;  %v181_v29 = vadd.f32 %v519_v9, %v180_v25 }
  0xde   :  { %397 = vpow2.f32 %v345_v20  ;;  %v346_v30 = vmul.f32 -1.442695, %v157_v22  ;;  %v354_v31 = vmul.f32 -1.442695, %v189_v23 }
  0xdf   :  { %399 = vpow2.f32 %v353_v21  ;;  %v344_v32 = vmul.f32 -1.442695, %v149_v28  ;;  %v352_v33 = vmul.f32 -1.442695, %v181_v29 }
  0xe0   :  { %401 = vpow2.f32 %v343_v26 }
  0xe1   :  { %403 = vpow2.f32 %v351_v27  ;;  %v376_v34 = vpop.f32.mrb[4].mxu0  ;;  %v384_v35 = vpop.f32.mrb[4].mxu1 }
  0xe2   :  { %405 = vpow2.f32 %v346_v30  ;;  %v170_v36 = vadd.f32 %v376_v34, %v519_v9  ;;  %v202_v37 = vadd.f32 %v384_v35, %v519_v9  ;;  %v161_v38 = vpop.f32.mrb[5].mxu0  ;;  %v193_v39 = vpop.f32.mrb[5].mxu1 }
  0xe3   :  { %407 = vpow2.f32 %v354_v31  ;;  %v162_v40 = vadd.f32 %v519_v9, %v161_v38  ;;  %v194_v41 = vadd.f32 %v519_v9, %v193_v39  ;;  %v377_v42 = vpop.f32.mrb[6].mxu0  ;;  %v385_v43 = vpop.f32.mrb[6].mxu1 }
  0xe4   :  { %409 = vpow2.f32 %v344_v32  ;;  %v349_v44 = vmul.f32 -1.442695, %v170_v36  ;;  %v357_v45 = vmul.f32 -1.442695, %v202_v37  ;;  %v173_v46 = vadd.f32 %v377_v42, %v519_v9  ;;  %v164_v47 = vpop.f32.mrb[7].mxu0  ;;  %v196_v48 = vpop.f32.mrb[7].mxu1 }
  0xe5   :  { %411 = vpow2.f32 %v352_v33  ;;  %v347_v49 = vmul.f32 -1.442695, %v162_v40  ;;  %v355_v50 = vmul.f32 -1.442695, %v194_v41  ;;  %v205_v5 = vadd.f32 %v385_v43, %v519_v9 }
  0xe6   :  { %413 = vpow2.f32 %v349_v44  ;;  %v350_v51 = vmul.f32 -1.442695, %v173_v46  ;;  %v165_v8 = vadd.f32 %v519_v9, %v164_v47  ;;  %v197_v12 = vadd.f32 %v519_v9, %v196_v48 }
  0xe7   :  { %415 = vpow2.f32 %v357_v45  ;;  %v358_v17 = vmul.f32 -1.442695, %v205_v5 }
  0xe8   :  { %v398_v52 = vpop.eup %397  ;;  %417 = vpow2.f32 %v347_v49  ;;  %v348_v20 = vmul.f32 -1.442695, %v165_v8  ;;  %v356_v9 = vmul.f32 -1.442695, %v197_v12 }
  0xe9   :  { %v400_v53 = vpop.eup %399  ;;  %v258_v54 = vadd.f32 1.0, %v398_v52  ;;  %419 = vpow2.f32 %v355_v50 }
  0xea   :  { %v402_v55 = vpop.eup %401  ;;  %v266_v56 = vadd.f32 1.0, %v400_v53  ;;  %421 = vpow2.f32 %v350_v51 }
  0xeb   :  { %v404_v57 = vpop.eup %403  ;;  %423 = vrcp.f32 %v258_v54  ;;  %v256_v58 = vadd.f32 1.0, %v402_v55 }
  0xec   :  { %v406_v59 = vpop.eup %405  ;;  %425 = vrcp.f32 %v266_v56  ;;  %v264_v60 = vadd.f32 1.0, %v404_v57 }
  0xed   :  { %v408_v61 = vpop.eup %407  ;;  %427 = vrcp.f32 %v256_v58  ;;  %v259_v62 = vadd.f32 1.0, %v406_v59 }
  0xee   :  { %v410_v63 = vpop.eup %409  ;;  %429 = vrcp.f32 %v264_v60  ;;  %v267_v0 = vadd.f32 1.0, %v408_v61 }
  0xef   :  { %v412_v1 = vpop.eup %411  ;;  %431 = vrcp.f32 %v259_v62  ;;  %v257_v2 = vadd.f32 1.0, %v410_v63 }
  0xf0   :  { %v414_v3 = vpop.eup %413  ;;  %433 = vrcp.f32 %v267_v0  ;;  %v265_v4 = vadd.f32 1.0, %v412_v1 }
  0xf1   :  { %v416_v6 = vpop.eup %415  ;;  %435 = vrcp.f32 %v257_v2  ;;  %v262_v7 = vadd.f32 1.0, %v414_v3 }
  0xf2   :  { %v418_v10 = vpop.eup %417  ;;  %437 = vrcp.f32 %v265_v4  ;;  %v270_v11 = vadd.f32 1.0, %v416_v6 }
  0xf3   :  { %v420_v13 = vpop.eup %419  ;;  %439 = vrcp.f32 %v262_v7  ;;  %v260_v14 = vadd.f32 1.0, %v418_v10 }
  0xf4   :  { %v422_v15 = vpop.eup %421  ;;  %441 = vrcp.f32 %v270_v11  ;;  %v268_v16 = vadd.f32 1.0, %v420_v13 }
  0xf5   :  { %v424_v18 = vpop.eup %423  ;;  %443 = vrcp.f32 %v260_v14  ;;  %v263_v19 = vadd.f32 1.0, %v422_v15 }
  0xf6   :  { %v426_v21 = vpop.eup %425  ;;  %307 = vst.msk [vmem:[%s604_s3 + $0x10] sm:$0xff] %vm304_vm1, %v424_v18  ;;  %445 = vrcp.f32 %v268_v16 }
  0xf7   :  { %v428_v22 = vpop.eup %427  ;;  %315 = vst.msk [vmem:[%s604_s3 + $0x50] sm:$0xff] %vm304_vm1, %v426_v21  ;;  %447 = vrcp.f32 %v263_v19 }
  0xf8   :  { %v430_v23 = vpop.eup %429  ;;  %305 = vst.msk [vmem:[%s604_s3] sm:$0xff] %vm304_vm1, %v428_v22  ;;  %449 = vpow2.f32 %v358_v17 }
  0xf9   :  { %v432_v24 = vpop.eup %431  ;;  %313 = vst.msk [vmem:[%s604_s3 + $0x40] sm:$0xff] %vm304_vm1, %v430_v23  ;;  %451 = vpow2.f32 %v348_v20 }
  0xfa   :  { %v434_v25 = vpop.eup %433  ;;  %308 = vst.msk [vmem:[%s604_s3 + $0x18] sm:$0xff] %vm304_vm1, %v432_v24  ;;  %453 = vpow2.f32 %v356_v9 }
  0xfb   :  { %v436_v26 = vpop.eup %435  ;;  %316 = vst.msk [vmem:[%s604_s3 + $0x58] sm:$0xff] %vm304_vm1, %v434_v25 }
  0xfc   :  { %v438_v27 = vpop.eup %437  ;;  %306 = vst.msk [vmem:[%s604_s3 + $0x8] sm:$0xff] %vm304_vm1, %v436_v26 }
  0xfd   :  { %v440_v28 = vpop.eup %439  ;;  %314 = vst.msk [vmem:[%s604_s3 + $0x48] sm:$0xff] %vm304_vm1, %v438_v27 }
  0xfe   :  { %v442_v29 = vpop.eup %441  ;;  %311 = vst.msk [vmem:[%s604_s3 + $0x30] sm:$0xff] %vm304_vm1, %v440_v28 }
  0xff   :  { %v444_v30 = vpop.eup %443  ;;  %319 = vst.msk [vmem:[%s604_s3 + $0x70] sm:$0xff] %vm304_vm1, %v442_v29 }
 0x100   :  { %v446_v31 = vpop.eup %445  ;;  %309 = vst.msk [vmem:[%s604_s3 + $0x20] sm:$0xff] %vm304_vm1, %v444_v30 }
 0x101   :  { %v448_v32 = vpop.eup %447  ;;  %317 = vst.msk [vmem:[%s604_s3 + $0x60] sm:$0xff] %vm304_vm1, %v446_v31 }
 0x102   :  { %v450_v33 = vpop.eup %449  ;;  %312 = vst.msk [vmem:[%s604_s3 + $0x38] sm:$0xff] %vm304_vm1, %v448_v32 }
 0x103   :  { %v452_v34 = vpop.eup %451  ;;  %v271_v35 = vadd.f32 1.0, %v450_v33 }
 0x104   :  { %v454_v36 = vpop.eup %453  ;;  %v261_v37 = vadd.f32 1.0, %v452_v34 }
 0x105   :  { %455 = vrcp.f32 %v271_v35  ;;  %v269_v38 = vadd.f32 1.0, %v454_v36 }
 0x106   :  { %457 = vrcp.f32 %v261_v37 }
 0x107   :  { %459 = vrcp.f32 %v269_v38 }
 0x10f   :  { %v456_v39 = vpop.eup %455 }
 0x110   :  { %v458_v40 = vpop.eup %457  ;;  %320 = vst.msk [vmem:[%s604_s3 + $0x78] sm:$0xff] %vm304_vm1, %v456_v39 }
 0x111   :  { %v460_v41 = vpop.eup %459  ;;  %310 = vst.msk [vmem:[%s604_s3 + $0x28] sm:$0xff] %vm304_vm1, %v458_v40 }
 0x112   :  { %318 = vst.msk [vmem:[%s604_s3 + $0x68] sm:$0xff] %vm304_vm1, %v460_v41 }

</bundles_post_ra>
